<compile_context>
chip_gen: v7x
topology: tpu7x:2x2x1
jax: 0.10.0
libtpu: 0.0.40
codegen_flags: <defaults>
</compile_context>

<pallas_src>
import functools

import jax
import jax.numpy as jnp
import numpy as np
from jax import lax
from jax.experimental import pallas as pl
from jax.experimental.pallas import tpu as pltpu

_LANES = 128
_CHUNK = 8                                    # one f32 vreg of sublanes

# (name, fan_in, fan_out) for fc1..fc4, fc_out
_LAYERS = (("1", 2, 5), ("2", 5, 5), ("3", 5, 5), ("4", 5, 5), ("o", 5, 2))


def _build_offsets():
    """Static flat offsets of each W (row-major [out,in]) and b in the packed slab."""
    offs = []
    off = 0
    for name, n_in, n_out in _LAYERS:
        w_off = off
        b_off = w_off + n_in * n_out
        off = b_off + n_out
        offs.append((name, n_in, n_out, w_off, b_off))
    return tuple(offs), off


_LAYER_OFFS, _N_PARAMS = _build_offsets()     # 117 real params
_PACKED_LEN = 128                             # padded slab length


def pack_params(params):
    """Pack all weights ([out,in], torch-native) and biases ([out]) into one
    f32 vector.  Call ONCE per parameter set (hoisted out of the forward)."""
    flat = np.zeros((_PACKED_LEN,), np.float32)
    for name, n_in, n_out, w_off, b_off in _LAYER_OFFS:
        w = np.asarray(params["w" + name], np.float32)   # [out, in]
        b = np.asarray(params["b" + name], np.float32)   # [out]
        flat[w_off:w_off + n_in * n_out] = w.reshape(-1)
        flat[b_off:b_off + n_out] = b.reshape(-1)
    return jnp.asarray(flat)


def mlp_kernel(p_ref, x_ref, out_ref):
    """One batch tile.

    p_ref   : SMEM f32[_PACKED_LEN]            -- packed weights/biases (resident)
    x_ref   : VMEM f32[2, block_rows, 128]     -- input features, batch lane-dense
    out_ref : VMEM f32[2, block_rows, 128]     -- class probabilities
    """
    block_rows = x_ref.shape[1]
    n_chunks = block_rows // _CHUNK
    n_feat_in = _LAYERS[0][1]

    # Hoist every weight/bias splat above the chunk loop: JAX does not CSE
    # broadcast_in_dim, so splatting inside the loop would re-materialize all
    # ~117 broadcasts per chunk and eat VALU slots in a VALU-bound kernel.
    layers = []
    for name, n_in, n_out, w_off, b_off in _LAYER_OFFS:
        w = [[jnp.full((_CHUNK, _LANES), p_ref[w_off + o * n_in + k], jnp.float32)
              for k in range(n_in)] for o in range(n_out)]
        b = [jnp.full((_CHUNK, _LANES), p_ref[b_off + o], jnp.float32)
             for o in range(n_out)]
        layers.append((name == "o", n_in, n_out, w, b))

    def chunk_body(c, carry):
        r0 = c * _CHUNK
        if not isinstance(r0, int):
            r0 = pl.multiple_of(r0, _CHUNK)   # aligned-slice hint for dynamic index
        rows = pl.ds(r0, _CHUNK)

        # Per-feature dense (8, 128) slabs for this chunk.
        h = [x_ref[f, rows, :] for f in range(n_feat_in)]

        # Unrolled scalar-broadcast FMAs on the VPU (dims <=5 -> no MXU).
        for is_out, n_in, n_out, w, b in layers:
            nxt = []
            for o in range(n_out):
                acc = w[o][0] * h[0]
                for k in range(1, n_in):
                    acc = acc + w[o][k] * h[k]
                acc = acc + b[o]
                if not is_out:
                    acc = jnp.maximum(acc, 0.0)
                nxt.append(acc)
            h = nxt

        # 2-class softmax in sigmoid form: p0 = 1 / (1 + exp(l1 - l0)).
        # Purely elementwise (classes are separate slabs -> no cross-lane
        # reduce); exp and approx reciprocal both run on the otherwise-idle
        # EUP.  The clip keeps exp() finite for extreme logits (the result is
        # already saturated at 0/1 there).
        l0, l1 = h
        d = jnp.clip(l1 - l0, -30.0, 30.0)
        p0 = pl.reciprocal(1.0 + jnp.exp(d), approx=True)
        out_ref[0, rows, :] = p0
        out_ref[1, rows, :] = 1.0 - p0
        return carry

    if n_chunks == 1:
        chunk_body(0, 0)
    else:
        # Unrolled enough for LLO scheduling visibility; capped to bound code
        # size for very large tiles.
        lax.fori_loop(0, n_chunks, chunk_body, 0,
                      unroll=n_chunks if n_chunks <= 8 else 8)


@functools.partial(jax.jit, static_argnames=("block_rows",))
def _net_forward_impl(x, packed, *, block_rows):
    B, f_in = x.shape
    tile_b = block_rows * _LANES
    n_tiles = pl.cdiv(B, tile_b)
    b_padded = n_tiles * tile_b

    x = x.astype(jnp.float32)
    if b_padded != B:
        x = jnp.pad(x, ((0, b_padded - B), (0, 0)))
    nb = b_padded // _LANES

    # Lane-dense layout: [B,2] -> [2, nb, 128].  Kept inside this jit so the
    # layout plumbing fuses with padding instead of adding extra dispatches.
    x_t = x.T.reshape(f_in, nb, _LANES)

    out_t = pl.pallas_call(
        mlp_kernel,
        out_shape=jax.ShapeDtypeStruct((2, nb, _LANES), jnp.float32),
        grid=(n_tiles,),
        in_specs=[
            # Packed weights/biases: tiny, resident in SMEM for cheap scalar reads.
            pl.BlockSpec(memory_space=pltpu.MemorySpace.SMEM),
            # Streaming batch tiles of x, auto-pipelined (double-buffered).
            pl.BlockSpec((f_in, block_rows, _LANES), lambda i: (0, i, 0)),
        ],
        out_specs=pl.BlockSpec((2, block_rows, _LANES), lambda i: (0, i, 0)),
        compiler_params=pltpu.CompilerParams(
            dimension_semantics=("parallel",),   # shard batch tiles across TCs on v7x
        ),
    )(packed, x_t)

    # [2, nb, 128] -> [B, 2]
    return out_t.reshape(2, b_padded).T[:B]


def _choose_block_rows(batch, max_block_rows=512):
    """Pick a tile size: >=2 grid steps when possible (both v7x TensorCores),
    tiles as big as allowed to amortize the ~0.35us per-step overhead."""
    nb = pl.cdiv(batch, _LANES)              # number of 128-row lane groups
    br = (nb // 2) // _CHUNK * _CHUNK
    return int(max(_CHUNK, min(br, max_block_rows)))


def net_forward(x, packed, *, block_rows=None):
    """x: [B, 2] float32, packed: pack_params(...).  Returns probabilities [B, 2]."""
    B, f_in = x.shape
    assert f_in == _LAYERS[0][1]
    if block_rows is None:
        block_rows = _choose_block_rows(B)
    assert block_rows >= _CHUNK and block_rows % _CHUNK == 0, block_rows
    return _net_forward_impl(x, packed, block_rows=block_rows)


def init_params(key):
    """Deterministic init mimicking nn.Linear's uniform(-1/sqrt(fan_in), ...).
    Weights are stored PyTorch-native as [out_features, in_features]."""
    params = {}
    for name, n_in, n_out in _LAYERS:
        key, kw, kb = jax.random.split(key, 3)
        bound = 1.0 / np.sqrt(n_in)
        params["w" + name] = jax.random.uniform(
            kw, (n_out, n_in), jnp.float32, minval=-bound, maxval=bound)
        params["b" + name] = jax.random.uniform(
            kb, (n_out,), jnp.float32, minval=-bound, maxval=bound)
    return params


def reference_forward(x, p):
    """Pure-JAX reference (explicit broadcast-sum; avoids MXU precision effects)."""
    def dense(h, w, b):  # w: [out, in]
        return jnp.sum(h[:, None, :] * w[None, :, :], axis=-1) + b

    h = x
    for name in ("1", "2", "3", "4"):
        h = jnp.maximum(dense(h, p["w" + name], p["b" + name]), 0.0)
    logits = dense(h, p["wo"], p["bo"])
    return jax.nn.softmax(logits, axis=-1)


if __name__ == "__main__":
    key = jax.random.PRNGKey(0)
    key, kx = jax.random.split(key)

    params = init_params(key)
    packed = pack_params(params)   # pack once, outside the per-call path

    # Batch exercising the lane-dense tiling with a 2-step grid (auto tile size).
    B = 2048
    x = jax.random.normal(kx, (B, 2), jnp.float32)
    ref = reference_forward(x, params)

    out = jax.block_until_ready(net_forward(x, packed))
    np.testing.assert_allclose(np.asarray(out), np.asarray(ref), rtol=2e-3, atol=2e-3)
    assert out.shape == (B, 2)

    # Multi-chunk, fully-unrolled inner-loop path (1 tile, 2 chunks).
    out2 = jax.block_until_ready(net_forward(x, packed, block_rows=16))
    np.testing.assert_allclose(np.asarray(out2), np.asarray(ref), rtol=2e-3, atol=2e-3)

    # Large-tile path: partially-unrolled chunk loop (16 chunks, unroll=8) + batch padding.
    out3 = jax.block_until_ready(net_forward(x, packed, block_rows=128))
    np.testing.assert_allclose(np.asarray(out3), np.asarray(ref), rtol=2e-3, atol=2e-3)

    # Non-aligned small batch exercises the padding path.
    x_small = jax.random.normal(jax.random.PRNGKey(1), (37, 2), jnp.float32)
    out_small = jax.block_until_ready(net_forward(x_small, packed))
    np.testing.assert_allclose(
        np.asarray(out_small), np.asarray(reference_forward(x_small, params)),
        rtol=2e-3, atol=2e-3)

    print("KERNEL_OK")
</pallas_src>

<mosaic_0001>
module attributes {stable_mosaic.version = 11 : i64} {
  func.func @mlp_kernel(%arg0: i32, %arg1: memref<128xf32, #tpu.memory_space<smem>>, %arg2: memref<2x8x128xf32, #tpu.memory_space<vmem>>, %arg3: memref<2x8x128xf32, #tpu.memory_space<vmem>>) attributes {dimension_semantics = [#tpu.dimension_semantics<parallel>], iteration_bounds = array<i64: 2>, scalar_prefetch = 0 : i64, scratch_operands = 0 : i64, tpu.core_type = #tpu.core_type<tc>, window_params = [{transform_indices = @transform_0, window_bounds = array<i64: 128>}, {transform_indices = @transform_1, window_bounds = array<i64: 2, 8, 128>}, {transform_indices = @transform_2, window_bounds = array<i64: 2, 8, 128>}]} {
    %c0 = arith.constant 0 : index
    %0 = memref.load %arg1[%c0] : memref<128xf32, #tpu.memory_space<smem>>
    %1 = vector.broadcast %0 : f32 to vector<8x128xf32>
    %c1 = arith.constant 1 : index
    %2 = memref.load %arg1[%c1] : memref<128xf32, #tpu.memory_space<smem>>
    %3 = vector.broadcast %2 : f32 to vector<8x128xf32>
    %c2 = arith.constant 2 : index
    %4 = memref.load %arg1[%c2] : memref<128xf32, #tpu.memory_space<smem>>
    %5 = vector.broadcast %4 : f32 to vector<8x128xf32>
    %c3 = arith.constant 3 : index
    %6 = memref.load %arg1[%c3] : memref<128xf32, #tpu.memory_space<smem>>
    %7 = vector.broadcast %6 : f32 to vector<8x128xf32>
    %c4 = arith.constant 4 : index
    %8 = memref.load %arg1[%c4] : memref<128xf32, #tpu.memory_space<smem>>
    %9 = vector.broadcast %8 : f32 to vector<8x128xf32>
    %c5 = arith.constant 5 : index
    %10 = memref.load %arg1[%c5] : memref<128xf32, #tpu.memory_space<smem>>
    %11 = vector.broadcast %10 : f32 to vector<8x128xf32>
    %c6 = arith.constant 6 : index
    %12 = memref.load %arg1[%c6] : memref<128xf32, #tpu.memory_space<smem>>
    %13 = vector.broadcast %12 : f32 to vector<8x128xf32>
    %c7 = arith.constant 7 : index
    %14 = memref.load %arg1[%c7] : memref<128xf32, #tpu.memory_space<smem>>
    %15 = vector.broadcast %14 : f32 to vector<8x128xf32>
    %c8 = arith.constant 8 : index
    %16 = memref.load %arg1[%c8] : memref<128xf32, #tpu.memory_space<smem>>
    %17 = vector.broadcast %16 : f32 to vector<8x128xf32>
    %c9 = arith.constant 9 : index
    %18 = memref.load %arg1[%c9] : memref<128xf32, #tpu.memory_space<smem>>
    %19 = vector.broadcast %18 : f32 to vector<8x128xf32>
    %c10 = arith.constant 10 : index
    %20 = memref.load %arg1[%c10] : memref<128xf32, #tpu.memory_space<smem>>
    %21 = vector.broadcast %20 : f32 to vector<8x128xf32>
    %c11 = arith.constant 11 : index
    %22 = memref.load %arg1[%c11] : memref<128xf32, #tpu.memory_space<smem>>
    %23 = vector.broadcast %22 : f32 to vector<8x128xf32>
    %c12 = arith.constant 12 : index
    %24 = memref.load %arg1[%c12] : memref<128xf32, #tpu.memory_space<smem>>
    %25 = vector.broadcast %24 : f32 to vector<8x128xf32>
    %c13 = arith.constant 13 : index
    %26 = memref.load %arg1[%c13] : memref<128xf32, #tpu.memory_space<smem>>
    %27 = vector.broadcast %26 : f32 to vector<8x128xf32>
    %c14 = arith.constant 14 : index
    %28 = memref.load %arg1[%c14] : memref<128xf32, #tpu.memory_space<smem>>
    %29 = vector.broadcast %28 : f32 to vector<8x128xf32>
    %c15 = arith.constant 15 : index
    %30 = memref.load %arg1[%c15] : memref<128xf32, #tpu.memory_space<smem>>
    %31 = vector.broadcast %30 : f32 to vector<8x128xf32>
    %c16 = arith.constant 16 : index
    %32 = memref.load %arg1[%c16] : memref<128xf32, #tpu.memory_space<smem>>
    %33 = vector.broadcast %32 : f32 to vector<8x128xf32>
    %c17 = arith.constant 17 : index
    %34 = memref.load %arg1[%c17] : memref<128xf32, #tpu.memory_space<smem>>
    %35 = vector.broadcast %34 : f32 to vector<8x128xf32>
    %c18 = arith.constant 18 : index
    %36 = memref.load %arg1[%c18] : memref<128xf32, #tpu.memory_space<smem>>
    %37 = vector.broadcast %36 : f32 to vector<8x128xf32>
    %c19 = arith.constant 19 : index
    %38 = memref.load %arg1[%c19] : memref<128xf32, #tpu.memory_space<smem>>
    %39 = vector.broadcast %38 : f32 to vector<8x128xf32>
    %c20 = arith.constant 20 : index
    %40 = memref.load %arg1[%c20] : memref<128xf32, #tpu.memory_space<smem>>
    %41 = vector.broadcast %40 : f32 to vector<8x128xf32>
    %c21 = arith.constant 21 : index
    %42 = memref.load %arg1[%c21] : memref<128xf32, #tpu.memory_space<smem>>
    %43 = vector.broadcast %42 : f32 to vector<8x128xf32>
    %c22 = arith.constant 22 : index
    %44 = memref.load %arg1[%c22] : memref<128xf32, #tpu.memory_space<smem>>
    %45 = vector.broadcast %44 : f32 to vector<8x128xf32>
    %c23 = arith.constant 23 : index
    %46 = memref.load %arg1[%c23] : memref<128xf32, #tpu.memory_space<smem>>
    %47 = vector.broadcast %46 : f32 to vector<8x128xf32>
    %c24 = arith.constant 24 : index
    %48 = memref.load %arg1[%c24] : memref<128xf32, #tpu.memory_space<smem>>
    %49 = vector.broadcast %48 : f32 to vector<8x128xf32>
    %c25 = arith.constant 25 : index
    %50 = memref.load %arg1[%c25] : memref<128xf32, #tpu.memory_space<smem>>
    %51 = vector.broadcast %50 : f32 to vector<8x128xf32>
    %c26 = arith.constant 26 : index
    %52 = memref.load %arg1[%c26] : memref<128xf32, #tpu.memory_space<smem>>
    %53 = vector.broadcast %52 : f32 to vector<8x128xf32>
    %c27 = arith.constant 27 : index
    %54 = memref.load %arg1[%c27] : memref<128xf32, #tpu.memory_space<smem>>
    %55 = vector.broadcast %54 : f32 to vector<8x128xf32>
    %c28 = arith.constant 28 : index
    %56 = memref.load %arg1[%c28] : memref<128xf32, #tpu.memory_space<smem>>
    %57 = vector.broadcast %56 : f32 to vector<8x128xf32>
    %c29 = arith.constant 29 : index
    %58 = memref.load %arg1[%c29] : memref<128xf32, #tpu.memory_space<smem>>
    %59 = vector.broadcast %58 : f32 to vector<8x128xf32>
    %c30 = arith.constant 30 : index
    %60 = memref.load %arg1[%c30] : memref<128xf32, #tpu.memory_space<smem>>
    %61 = vector.broadcast %60 : f32 to vector<8x128xf32>
    %c31 = arith.constant 31 : index
    %62 = memref.load %arg1[%c31] : memref<128xf32, #tpu.memory_space<smem>>
    %63 = vector.broadcast %62 : f32 to vector<8x128xf32>
    %c32 = arith.constant 32 : index
    %64 = memref.load %arg1[%c32] : memref<128xf32, #tpu.memory_space<smem>>
    %65 = vector.broadcast %64 : f32 to vector<8x128xf32>
    %c33 = arith.constant 33 : index
    %66 = memref.load %arg1[%c33] : memref<128xf32, #tpu.memory_space<smem>>
    %67 = vector.broadcast %66 : f32 to vector<8x128xf32>
    %c34 = arith.constant 34 : index
    %68 = memref.load %arg1[%c34] : memref<128xf32, #tpu.memory_space<smem>>
    %69 = vector.broadcast %68 : f32 to vector<8x128xf32>
    %c35 = arith.constant 35 : index
    %70 = memref.load %arg1[%c35] : memref<128xf32, #tpu.memory_space<smem>>
    %71 = vector.broadcast %70 : f32 to vector<8x128xf32>
    %c36 = arith.constant 36 : index
    %72 = memref.load %arg1[%c36] : memref<128xf32, #tpu.memory_space<smem>>
    %73 = vector.broadcast %72 : f32 to vector<8x128xf32>
    %c37 = arith.constant 37 : index
    %74 = memref.load %arg1[%c37] : memref<128xf32, #tpu.memory_space<smem>>
    %75 = vector.broadcast %74 : f32 to vector<8x128xf32>
    %c38 = arith.constant 38 : index
    %76 = memref.load %arg1[%c38] : memref<128xf32, #tpu.memory_space<smem>>
    %77 = vector.broadcast %76 : f32 to vector<8x128xf32>
    %c39 = arith.constant 39 : index
    %78 = memref.load %arg1[%c39] : memref<128xf32, #tpu.memory_space<smem>>
    %79 = vector.broadcast %78 : f32 to vector<8x128xf32>
    %c40 = arith.constant 40 : index
    %80 = memref.load %arg1[%c40] : memref<128xf32, #tpu.memory_space<smem>>
    %81 = vector.broadcast %80 : f32 to vector<8x128xf32>
    %c41 = arith.constant 41 : index
    %82 = memref.load %arg1[%c41] : memref<128xf32, #tpu.memory_space<smem>>
    %83 = vector.broadcast %82 : f32 to vector<8x128xf32>
    %c42 = arith.constant 42 : index
    %84 = memref.load %arg1[%c42] : memref<128xf32, #tpu.memory_space<smem>>
    %85 = vector.broadcast %84 : f32 to vector<8x128xf32>
    %c43 = arith.constant 43 : index
    %86 = memref.load %arg1[%c43] : memref<128xf32, #tpu.memory_space<smem>>
    %87 = vector.broadcast %86 : f32 to vector<8x128xf32>
    %c44 = arith.constant 44 : index
    %88 = memref.load %arg1[%c44] : memref<128xf32, #tpu.memory_space<smem>>
    %89 = vector.broadcast %88 : f32 to vector<8x128xf32>
    %c45 = arith.constant 45 : index
    %90 = memref.load %arg1[%c45] : memref<128xf32, #tpu.memory_space<smem>>
    %91 = vector.broadcast %90 : f32 to vector<8x128xf32>
    %c46 = arith.constant 46 : index
    %92 = memref.load %arg1[%c46] : memref<128xf32, #tpu.memory_space<smem>>
    %93 = vector.broadcast %92 : f32 to vector<8x128xf32>
    %c47 = arith.constant 47 : index
    %94 = memref.load %arg1[%c47] : memref<128xf32, #tpu.memory_space<smem>>
    %95 = vector.broadcast %94 : f32 to vector<8x128xf32>
    %c48 = arith.constant 48 : index
    %96 = memref.load %arg1[%c48] : memref<128xf32, #tpu.memory_space<smem>>
    %97 = vector.broadcast %96 : f32 to vector<8x128xf32>
    %c49 = arith.constant 49 : index
    %98 = memref.load %arg1[%c49] : memref<128xf32, #tpu.memory_space<smem>>
    %99 = vector.broadcast %98 : f32 to vector<8x128xf32>
    %c50 = arith.constant 50 : index
    %100 = memref.load %arg1[%c50] : memref<128xf32, #tpu.memory_space<smem>>
    %101 = vector.broadcast %100 : f32 to vector<8x128xf32>
    %c51 = arith.constant 51 : index
    %102 = memref.load %arg1[%c51] : memref<128xf32, #tpu.memory_space<smem>>
    %103 = vector.broadcast %102 : f32 to vector<8x128xf32>
    %c52 = arith.constant 52 : index
    %104 = memref.load %arg1[%c52] : memref<128xf32, #tpu.memory_space<smem>>
    %105 = vector.broadcast %104 : f32 to vector<8x128xf32>
    %c53 = arith.constant 53 : index
    %106 = memref.load %arg1[%c53] : memref<128xf32, #tpu.memory_space<smem>>
    %107 = vector.broadcast %106 : f32 to vector<8x128xf32>
    %c54 = arith.constant 54 : index
    %108 = memref.load %arg1[%c54] : memref<128xf32, #tpu.memory_space<smem>>
    %109 = vector.broadcast %108 : f32 to vector<8x128xf32>
    %c55 = arith.constant 55 : index
    %110 = memref.load %arg1[%c55] : memref<128xf32, #tpu.memory_space<smem>>
    %111 = vector.broadcast %110 : f32 to vector<8x128xf32>
    %c56 = arith.constant 56 : index
    %112 = memref.load %arg1[%c56] : memref<128xf32, #tpu.memory_space<smem>>
    %113 = vector.broadcast %112 : f32 to vector<8x128xf32>
    %c57 = arith.constant 57 : index
    %114 = memref.load %arg1[%c57] : memref<128xf32, #tpu.memory_space<smem>>
    %115 = vector.broadcast %114 : f32 to vector<8x128xf32>
    %c58 = arith.constant 58 : index
    %116 = memref.load %arg1[%c58] : memref<128xf32, #tpu.memory_space<smem>>
    %117 = vector.broadcast %116 : f32 to vector<8x128xf32>
    %c59 = arith.constant 59 : index
    %118 = memref.load %arg1[%c59] : memref<128xf32, #tpu.memory_space<smem>>
    %119 = vector.broadcast %118 : f32 to vector<8x128xf32>
    %c60 = arith.constant 60 : index
    %120 = memref.load %arg1[%c60] : memref<128xf32, #tpu.memory_space<smem>>
    %121 = vector.broadcast %120 : f32 to vector<8x128xf32>
    %c61 = arith.constant 61 : index
    %122 = memref.load %arg1[%c61] : memref<128xf32, #tpu.memory_space<smem>>
    %123 = vector.broadcast %122 : f32 to vector<8x128xf32>
    %c62 = arith.constant 62 : index
    %124 = memref.load %arg1[%c62] : memref<128xf32, #tpu.memory_space<smem>>
    %125 = vector.broadcast %124 : f32 to vector<8x128xf32>
    %c63 = arith.constant 63 : index
    %126 = memref.load %arg1[%c63] : memref<128xf32, #tpu.memory_space<smem>>
    %127 = vector.broadcast %126 : f32 to vector<8x128xf32>
    %c64 = arith.constant 64 : index
    %128 = memref.load %arg1[%c64] : memref<128xf32, #tpu.memory_space<smem>>
    %129 = vector.broadcast %128 : f32 to vector<8x128xf32>
    %c65 = arith.constant 65 : index
    %130 = memref.load %arg1[%c65] : memref<128xf32, #tpu.memory_space<smem>>
    %131 = vector.broadcast %130 : f32 to vector<8x128xf32>
    %c66 = arith.constant 66 : index
    %132 = memref.load %arg1[%c66] : memref<128xf32, #tpu.memory_space<smem>>
    %133 = vector.broadcast %132 : f32 to vector<8x128xf32>
    %c67 = arith.constant 67 : index
    %134 = memref.load %arg1[%c67] : memref<128xf32, #tpu.memory_space<smem>>
    %135 = vector.broadcast %134 : f32 to vector<8x128xf32>
    %c68 = arith.constant 68 : index
    %136 = memref.load %arg1[%c68] : memref<128xf32, #tpu.memory_space<smem>>
    %137 = vector.broadcast %136 : f32 to vector<8x128xf32>
    %c69 = arith.constant 69 : index
    %138 = memref.load %arg1[%c69] : memref<128xf32, #tpu.memory_space<smem>>
    %139 = vector.broadcast %138 : f32 to vector<8x128xf32>
    %c70 = arith.constant 70 : index
    %140 = memref.load %arg1[%c70] : memref<128xf32, #tpu.memory_space<smem>>
    %141 = vector.broadcast %140 : f32 to vector<8x128xf32>
    %c71 = arith.constant 71 : index
    %142 = memref.load %arg1[%c71] : memref<128xf32, #tpu.memory_space<smem>>
    %143 = vector.broadcast %142 : f32 to vector<8x128xf32>
    %c72 = arith.constant 72 : index
    %144 = memref.load %arg1[%c72] : memref<128xf32, #tpu.memory_space<smem>>
    %145 = vector.broadcast %144 : f32 to vector<8x128xf32>
    %c73 = arith.constant 73 : index
    %146 = memref.load %arg1[%c73] : memref<128xf32, #tpu.memory_space<smem>>
    %147 = vector.broadcast %146 : f32 to vector<8x128xf32>
    %c74 = arith.constant 74 : index
    %148 = memref.load %arg1[%c74] : memref<128xf32, #tpu.memory_space<smem>>
    %149 = vector.broadcast %148 : f32 to vector<8x128xf32>
    %c75 = arith.constant 75 : index
    %150 = memref.load %arg1[%c75] : memref<128xf32, #tpu.memory_space<smem>>
    %151 = vector.broadcast %150 : f32 to vector<8x128xf32>
    %c76 = arith.constant 76 : index
    %152 = memref.load %arg1[%c76] : memref<128xf32, #tpu.memory_space<smem>>
    %153 = vector.broadcast %152 : f32 to vector<8x128xf32>
    %c77 = arith.constant 77 : index
    %154 = memref.load %arg1[%c77] : memref<128xf32, #tpu.memory_space<smem>>
    %155 = vector.broadcast %154 : f32 to vector<8x128xf32>
    %c78 = arith.constant 78 : index
    %156 = memref.load %arg1[%c78] : memref<128xf32, #tpu.memory_space<smem>>
    %157 = vector.broadcast %156 : f32 to vector<8x128xf32>
    %c79 = arith.constant 79 : index
    %158 = memref.load %arg1[%c79] : memref<128xf32, #tpu.memory_space<smem>>
    %159 = vector.broadcast %158 : f32 to vector<8x128xf32>
    %c80 = arith.constant 80 : index
    %160 = memref.load %arg1[%c80] : memref<128xf32, #tpu.memory_space<smem>>
    %161 = vector.broadcast %160 : f32 to vector<8x128xf32>
    %c81 = arith.constant 81 : index
    %162 = memref.load %arg1[%c81] : memref<128xf32, #tpu.memory_space<smem>>
    %163 = vector.broadcast %162 : f32 to vector<8x128xf32>
    %c82 = arith.constant 82 : index
    %164 = memref.load %arg1[%c82] : memref<128xf32, #tpu.memory_space<smem>>
    %165 = vector.broadcast %164 : f32 to vector<8x128xf32>
    %c83 = arith.constant 83 : index
    %166 = memref.load %arg1[%c83] : memref<128xf32, #tpu.memory_space<smem>>
    %167 = vector.broadcast %166 : f32 to vector<8x128xf32>
    %c84 = arith.constant 84 : index
    %168 = memref.load %arg1[%c84] : memref<128xf32, #tpu.memory_space<smem>>
    %169 = vector.broadcast %168 : f32 to vector<8x128xf32>
    %c85 = arith.constant 85 : index
    %170 = memref.load %arg1[%c85] : memref<128xf32, #tpu.memory_space<smem>>
    %171 = vector.broadcast %170 : f32 to vector<8x128xf32>
    %c86 = arith.constant 86 : index
    %172 = memref.load %arg1[%c86] : memref<128xf32, #tpu.memory_space<smem>>
    %173 = vector.broadcast %172 : f32 to vector<8x128xf32>
    %c87 = arith.constant 87 : index
    %174 = memref.load %arg1[%c87] : memref<128xf32, #tpu.memory_space<smem>>
    %175 = vector.broadcast %174 : f32 to vector<8x128xf32>
    %c88 = arith.constant 88 : index
    %176 = memref.load %arg1[%c88] : memref<128xf32, #tpu.memory_space<smem>>
    %177 = vector.broadcast %176 : f32 to vector<8x128xf32>
    %c89 = arith.constant 89 : index
    %178 = memref.load %arg1[%c89] : memref<128xf32, #tpu.memory_space<smem>>
    %179 = vector.broadcast %178 : f32 to vector<8x128xf32>
    %c90 = arith.constant 90 : index
    %180 = memref.load %arg1[%c90] : memref<128xf32, #tpu.memory_space<smem>>
    %181 = vector.broadcast %180 : f32 to vector<8x128xf32>
    %c91 = arith.constant 91 : index
    %182 = memref.load %arg1[%c91] : memref<128xf32, #tpu.memory_space<smem>>
    %183 = vector.broadcast %182 : f32 to vector<8x128xf32>
    %c92 = arith.constant 92 : index
    %184 = memref.load %arg1[%c92] : memref<128xf32, #tpu.memory_space<smem>>
    %185 = vector.broadcast %184 : f32 to vector<8x128xf32>
    %c93 = arith.constant 93 : index
    %186 = memref.load %arg1[%c93] : memref<128xf32, #tpu.memory_space<smem>>
    %187 = vector.broadcast %186 : f32 to vector<8x128xf32>
    %c94 = arith.constant 94 : index
    %188 = memref.load %arg1[%c94] : memref<128xf32, #tpu.memory_space<smem>>
    %189 = vector.broadcast %188 : f32 to vector<8x128xf32>
    %c95 = arith.constant 95 : index
    %190 = memref.load %arg1[%c95] : memref<128xf32, #tpu.memory_space<smem>>
    %191 = vector.broadcast %190 : f32 to vector<8x128xf32>
    %c96 = arith.constant 96 : index
    %192 = memref.load %arg1[%c96] : memref<128xf32, #tpu.memory_space<smem>>
    %193 = vector.broadcast %192 : f32 to vector<8x128xf32>
    %c97 = arith.constant 97 : index
    %194 = memref.load %arg1[%c97] : memref<128xf32, #tpu.memory_space<smem>>
    %195 = vector.broadcast %194 : f32 to vector<8x128xf32>
    %c98 = arith.constant 98 : index
    %196 = memref.load %arg1[%c98] : memref<128xf32, #tpu.memory_space<smem>>
    %197 = vector.broadcast %196 : f32 to vector<8x128xf32>
    %c99 = arith.constant 99 : index
    %198 = memref.load %arg1[%c99] : memref<128xf32, #tpu.memory_space<smem>>
    %199 = vector.broadcast %198 : f32 to vector<8x128xf32>
    %c100 = arith.constant 100 : index
    %200 = memref.load %arg1[%c100] : memref<128xf32, #tpu.memory_space<smem>>
    %201 = vector.broadcast %200 : f32 to vector<8x128xf32>
    %c101 = arith.constant 101 : index
    %202 = memref.load %arg1[%c101] : memref<128xf32, #tpu.memory_space<smem>>
    %203 = vector.broadcast %202 : f32 to vector<8x128xf32>
    %c102 = arith.constant 102 : index
    %204 = memref.load %arg1[%c102] : memref<128xf32, #tpu.memory_space<smem>>
    %205 = vector.broadcast %204 : f32 to vector<8x128xf32>
    %c103 = arith.constant 103 : index
    %206 = memref.load %arg1[%c103] : memref<128xf32, #tpu.memory_space<smem>>
    %207 = vector.broadcast %206 : f32 to vector<8x128xf32>
    %c104 = arith.constant 104 : index
    %208 = memref.load %arg1[%c104] : memref<128xf32, #tpu.memory_space<smem>>
    %209 = vector.broadcast %208 : f32 to vector<8x128xf32>
    %c105 = arith.constant 105 : index
    %210 = memref.load %arg1[%c105] : memref<128xf32, #tpu.memory_space<smem>>
    %211 = vector.broadcast %210 : f32 to vector<8x128xf32>
    %c106 = arith.constant 106 : index
    %212 = memref.load %arg1[%c106] : memref<128xf32, #tpu.memory_space<smem>>
    %213 = vector.broadcast %212 : f32 to vector<8x128xf32>
    %c107 = arith.constant 107 : index
    %214 = memref.load %arg1[%c107] : memref<128xf32, #tpu.memory_space<smem>>
    %215 = vector.broadcast %214 : f32 to vector<8x128xf32>
    %c108 = arith.constant 108 : index
    %216 = memref.load %arg1[%c108] : memref<128xf32, #tpu.memory_space<smem>>
    %217 = vector.broadcast %216 : f32 to vector<8x128xf32>
    %c109 = arith.constant 109 : index
    %218 = memref.load %arg1[%c109] : memref<128xf32, #tpu.memory_space<smem>>
    %219 = vector.broadcast %218 : f32 to vector<8x128xf32>
    %c110 = arith.constant 110 : index
    %220 = memref.load %arg1[%c110] : memref<128xf32, #tpu.memory_space<smem>>
    %221 = vector.broadcast %220 : f32 to vector<8x128xf32>
    %c111 = arith.constant 111 : index
    %222 = memref.load %arg1[%c111] : memref<128xf32, #tpu.memory_space<smem>>
    %223 = vector.broadcast %222 : f32 to vector<8x128xf32>
    %c112 = arith.constant 112 : index
    %224 = memref.load %arg1[%c112] : memref<128xf32, #tpu.memory_space<smem>>
    %225 = vector.broadcast %224 : f32 to vector<8x128xf32>
    %c113 = arith.constant 113 : index
    %226 = memref.load %arg1[%c113] : memref<128xf32, #tpu.memory_space<smem>>
    %227 = vector.broadcast %226 : f32 to vector<8x128xf32>
    %c114 = arith.constant 114 : index
    %228 = memref.load %arg1[%c114] : memref<128xf32, #tpu.memory_space<smem>>
    %229 = vector.broadcast %228 : f32 to vector<8x128xf32>
    %c115 = arith.constant 115 : index
    %230 = memref.load %arg1[%c115] : memref<128xf32, #tpu.memory_space<smem>>
    %231 = vector.broadcast %230 : f32 to vector<8x128xf32>
    %c116 = arith.constant 116 : index
    %232 = memref.load %arg1[%c116] : memref<128xf32, #tpu.memory_space<smem>>
    %233 = vector.broadcast %232 : f32 to vector<8x128xf32>
    %c0_0 = arith.constant 0 : index
    %c0_1 = arith.constant 0 : index
    %c0_2 = arith.constant 0 : index
    %234 = vector.load %arg2[%c0_0, %c0_1, %c0_2] : memref<2x8x128xf32, #tpu.memory_space<vmem>>, vector<1x8x128xf32>
    %235 = vector.shape_cast %234 : vector<1x8x128xf32> to vector<8x128xf32>
    %c1_3 = arith.constant 1 : index
    %c0_4 = arith.constant 0 : index
    %c0_5 = arith.constant 0 : index
    %236 = vector.load %arg2[%c1_3, %c0_4, %c0_5] : memref<2x8x128xf32, #tpu.memory_space<vmem>>, vector<1x8x128xf32>
    %237 = vector.shape_cast %236 : vector<1x8x128xf32> to vector<8x128xf32>
    %238 = arith.mulf %1, %235 : vector<8x128xf32>
    %239 = arith.mulf %3, %237 : vector<8x128xf32>
    %240 = arith.addf %238, %239 : vector<8x128xf32>
    %241 = arith.addf %240, %21 : vector<8x128xf32>
    %cst = arith.constant 0.000000e+00 : f32
    %242 = vector.broadcast %cst : f32 to vector<8x128xf32>
    %243 = arith.maximumf %241, %242 : vector<8x128xf32>
    %244 = arith.mulf %5, %235 : vector<8x128xf32>
    %245 = arith.mulf %7, %237 : vector<8x128xf32>
    %246 = arith.addf %244, %245 : vector<8x128xf32>
    %247 = arith.addf %246, %23 : vector<8x128xf32>
    %cst_6 = arith.constant 0.000000e+00 : f32
    %248 = vector.broadcast %cst_6 : f32 to vector<8x128xf32>
    %249 = arith.maximumf %247, %248 : vector<8x128xf32>
    %250 = arith.mulf %9, %235 : vector<8x128xf32>
    %251 = arith.mulf %11, %237 : vector<8x128xf32>
    %252 = arith.addf %250, %251 : vector<8x128xf32>
    %253 = arith.addf %252, %25 : vector<8x128xf32>
    %cst_7 = arith.constant 0.000000e+00 : f32
    %254 = vector.broadcast %cst_7 : f32 to vector<8x128xf32>
    %255 = arith.maximumf %253, %254 : vector<8x128xf32>
    %256 = arith.mulf %13, %235 : vector<8x128xf32>
    %257 = arith.mulf %15, %237 : vector<8x128xf32>
    %258 = arith.addf %256, %257 : vector<8x128xf32>
    %259 = arith.addf %258, %27 : vector<8x128xf32>
    %cst_8 = arith.constant 0.000000e+00 : f32
    %260 = vector.broadcast %cst_8 : f32 to vector<8x128xf32>
    %261 = arith.maximumf %259, %260 : vector<8x128xf32>
    %262 = arith.mulf %17, %235 : vector<8x128xf32>
    %263 = arith.mulf %19, %237 : vector<8x128xf32>
    %264 = arith.addf %262, %263 : vector<8x128xf32>
    %265 = arith.addf %264, %29 : vector<8x128xf32>
    %cst_9 = arith.constant 0.000000e+00 : f32
    %266 = vector.broadcast %cst_9 : f32 to vector<8x128xf32>
    %267 = arith.maximumf %265, %266 : vector<8x128xf32>
    %268 = arith.mulf %31, %243 : vector<8x128xf32>
    %269 = arith.mulf %33, %249 : vector<8x128xf32>
    %270 = arith.addf %268, %269 : vector<8x128xf32>
    %271 = arith.mulf %35, %255 : vector<8x128xf32>
    %272 = arith.addf %270, %271 : vector<8x128xf32>
    %273 = arith.mulf %37, %261 : vector<8x128xf32>
    %274 = arith.addf %272, %273 : vector<8x128xf32>
    %275 = arith.mulf %39, %267 : vector<8x128xf32>
    %276 = arith.addf %274, %275 : vector<8x128xf32>
    %277 = arith.addf %276, %81 : vector<8x128xf32>
    %cst_10 = arith.constant 0.000000e+00 : f32
    %278 = vector.broadcast %cst_10 : f32 to vector<8x128xf32>
    %279 = arith.maximumf %277, %278 : vector<8x128xf32>
    %280 = arith.mulf %41, %243 : vector<8x128xf32>
    %281 = arith.mulf %43, %249 : vector<8x128xf32>
    %282 = arith.addf %280, %281 : vector<8x128xf32>
    %283 = arith.mulf %45, %255 : vector<8x128xf32>
    %284 = arith.addf %282, %283 : vector<8x128xf32>
    %285 = arith.mulf %47, %261 : vector<8x128xf32>
    %286 = arith.addf %284, %285 : vector<8x128xf32>
    %287 = arith.mulf %49, %267 : vector<8x128xf32>
    %288 = arith.addf %286, %287 : vector<8x128xf32>
    %289 = arith.addf %288, %83 : vector<8x128xf32>
    %cst_11 = arith.constant 0.000000e+00 : f32
    %290 = vector.broadcast %cst_11 : f32 to vector<8x128xf32>
    %291 = arith.maximumf %289, %290 : vector<8x128xf32>
    %292 = arith.mulf %51, %243 : vector<8x128xf32>
    %293 = arith.mulf %53, %249 : vector<8x128xf32>
    %294 = arith.addf %292, %293 : vector<8x128xf32>
    %295 = arith.mulf %55, %255 : vector<8x128xf32>
    %296 = arith.addf %294, %295 : vector<8x128xf32>
    %297 = arith.mulf %57, %261 : vector<8x128xf32>
    %298 = arith.addf %296, %297 : vector<8x128xf32>
    %299 = arith.mulf %59, %267 : vector<8x128xf32>
    %300 = arith.addf %298, %299 : vector<8x128xf32>
    %301 = arith.addf %300, %85 : vector<8x128xf32>
    %cst_12 = arith.constant 0.000000e+00 : f32
    %302 = vector.broadcast %cst_12 : f32 to vector<8x128xf32>
    %303 = arith.maximumf %301, %302 : vector<8x128xf32>
    %304 = arith.mulf %61, %243 : vector<8x128xf32>
    %305 = arith.mulf %63, %249 : vector<8x128xf32>
    %306 = arith.addf %304, %305 : vector<8x128xf32>
    %307 = arith.mulf %65, %255 : vector<8x128xf32>
    %308 = arith.addf %306, %307 : vector<8x128xf32>
    %309 = arith.mulf %67, %261 : vector<8x128xf32>
    %310 = arith.addf %308, %309 : vector<8x128xf32>
    %311 = arith.mulf %69, %267 : vector<8x128xf32>
    %312 = arith.addf %310, %311 : vector<8x128xf32>
    %313 = arith.addf %312, %87 : vector<8x128xf32>
    %cst_13 = arith.constant 0.000000e+00 : f32
    %314 = vector.broadcast %cst_13 : f32 to vector<8x128xf32>
    %315 = arith.maximumf %313, %314 : vector<8x128xf32>
    %316 = arith.mulf %71, %243 : vector<8x128xf32>
    %317 = arith.mulf %73, %249 : vector<8x128xf32>
    %318 = arith.addf %316, %317 : vector<8x128xf32>
    %319 = arith.mulf %75, %255 : vector<8x128xf32>
    %320 = arith.addf %318, %319 : vector<8x128xf32>
    %321 = arith.mulf %77, %261 : vector<8x128xf32>
    %322 = arith.addf %320, %321 : vector<8x128xf32>
    %323 = arith.mulf %79, %267 : vector<8x128xf32>
    %324 = arith.addf %322, %323 : vector<8x128xf32>
    %325 = arith.addf %324, %89 : vector<8x128xf32>
    %cst_14 = arith.constant 0.000000e+00 : f32
    %326 = vector.broadcast %cst_14 : f32 to vector<8x128xf32>
    %327 = arith.maximumf %325, %326 : vector<8x128xf32>
    %328 = arith.mulf %91, %279 : vector<8x128xf32>
    %329 = arith.mulf %93, %291 : vector<8x128xf32>
    %330 = arith.addf %328, %329 : vector<8x128xf32>
    %331 = arith.mulf %95, %303 : vector<8x128xf32>
    %332 = arith.addf %330, %331 : vector<8x128xf32>
    %333 = arith.mulf %97, %315 : vector<8x128xf32>
    %334 = arith.addf %332, %333 : vector<8x128xf32>
    %335 = arith.mulf %99, %327 : vector<8x128xf32>
    %336 = arith.addf %334, %335 : vector<8x128xf32>
    %337 = arith.addf %336, %141 : vector<8x128xf32>
    %cst_15 = arith.constant 0.000000e+00 : f32
    %338 = vector.broadcast %cst_15 : f32 to vector<8x128xf32>
    %339 = arith.maximumf %337, %338 : vector<8x128xf32>
    %340 = arith.mulf %101, %279 : vector<8x128xf32>
    %341 = arith.mulf %103, %291 : vector<8x128xf32>
    %342 = arith.addf %340, %341 : vector<8x128xf32>
    %343 = arith.mulf %105, %303 : vector<8x128xf32>
    %344 = arith.addf %342, %343 : vector<8x128xf32>
    %345 = arith.mulf %107, %315 : vector<8x128xf32>
    %346 = arith.addf %344, %345 : vector<8x128xf32>
    %347 = arith.mulf %109, %327 : vector<8x128xf32>
    %348 = arith.addf %346, %347 : vector<8x128xf32>
    %349 = arith.addf %348, %143 : vector<8x128xf32>
    %cst_16 = arith.constant 0.000000e+00 : f32
    %350 = vector.broadcast %cst_16 : f32 to vector<8x128xf32>
    %351 = arith.maximumf %349, %350 : vector<8x128xf32>
    %352 = arith.mulf %111, %279 : vector<8x128xf32>
    %353 = arith.mulf %113, %291 : vector<8x128xf32>
    %354 = arith.addf %352, %353 : vector<8x128xf32>
    %355 = arith.mulf %115, %303 : vector<8x128xf32>
    %356 = arith.addf %354, %355 : vector<8x128xf32>
    %357 = arith.mulf %117, %315 : vector<8x128xf32>
    %358 = arith.addf %356, %357 : vector<8x128xf32>
    %359 = arith.mulf %119, %327 : vector<8x128xf32>
    %360 = arith.addf %358, %359 : vector<8x128xf32>
    %361 = arith.addf %360, %145 : vector<8x128xf32>
    %cst_17 = arith.constant 0.000000e+00 : f32
    %362 = vector.broadcast %cst_17 : f32 to vector<8x128xf32>
    %363 = arith.maximumf %361, %362 : vector<8x128xf32>
    %364 = arith.mulf %121, %279 : vector<8x128xf32>
    %365 = arith.mulf %123, %291 : vector<8x128xf32>
    %366 = arith.addf %364, %365 : vector<8x128xf32>
    %367 = arith.mulf %125, %303 : vector<8x128xf32>
    %368 = arith.addf %366, %367 : vector<8x128xf32>
    %369 = arith.mulf %127, %315 : vector<8x128xf32>
    %370 = arith.addf %368, %369 : vector<8x128xf32>
    %371 = arith.mulf %129, %327 : vector<8x128xf32>
    %372 = arith.addf %370, %371 : vector<8x128xf32>
    %373 = arith.addf %372, %147 : vector<8x128xf32>
    %cst_18 = arith.constant 0.000000e+00 : f32
    %374 = vector.broadcast %cst_18 : f32 to vector<8x128xf32>
    %375 = arith.maximumf %373, %374 : vector<8x128xf32>
    %376 = arith.mulf %131, %279 : vector<8x128xf32>
    %377 = arith.mulf %133, %291 : vector<8x128xf32>
    %378 = arith.addf %376, %377 : vector<8x128xf32>
    %379 = arith.mulf %135, %303 : vector<8x128xf32>
    %380 = arith.addf %378, %379 : vector<8x128xf32>
    %381 = arith.mulf %137, %315 : vector<8x128xf32>
    %382 = arith.addf %380, %381 : vector<8x128xf32>
    %383 = arith.mulf %139, %327 : vector<8x128xf32>
    %384 = arith.addf %382, %383 : vector<8x128xf32>
    %385 = arith.addf %384, %149 : vector<8x128xf32>
    %cst_19 = arith.constant 0.000000e+00 : f32
    %386 = vector.broadcast %cst_19 : f32 to vector<8x128xf32>
    %387 = arith.maximumf %385, %386 : vector<8x128xf32>
    %388 = arith.mulf %151, %339 : vector<8x128xf32>
    %389 = arith.mulf %153, %351 : vector<8x128xf32>
    %390 = arith.addf %388, %389 : vector<8x128xf32>
    %391 = arith.mulf %155, %363 : vector<8x128xf32>
    %392 = arith.addf %390, %391 : vector<8x128xf32>
    %393 = arith.mulf %157, %375 : vector<8x128xf32>
    %394 = arith.addf %392, %393 : vector<8x128xf32>
    %395 = arith.mulf %159, %387 : vector<8x128xf32>
    %396 = arith.addf %394, %395 : vector<8x128xf32>
    %397 = arith.addf %396, %201 : vector<8x128xf32>
    %cst_20 = arith.constant 0.000000e+00 : f32
    %398 = vector.broadcast %cst_20 : f32 to vector<8x128xf32>
    %399 = arith.maximumf %397, %398 : vector<8x128xf32>
    %400 = arith.mulf %161, %339 : vector<8x128xf32>
    %401 = arith.mulf %163, %351 : vector<8x128xf32>
    %402 = arith.addf %400, %401 : vector<8x128xf32>
    %403 = arith.mulf %165, %363 : vector<8x128xf32>
    %404 = arith.addf %402, %403 : vector<8x128xf32>
    %405 = arith.mulf %167, %375 : vector<8x128xf32>
    %406 = arith.addf %404, %405 : vector<8x128xf32>
    %407 = arith.mulf %169, %387 : vector<8x128xf32>
    %408 = arith.addf %406, %407 : vector<8x128xf32>
    %409 = arith.addf %408, %203 : vector<8x128xf32>
    %cst_21 = arith.constant 0.000000e+00 : f32
    %410 = vector.broadcast %cst_21 : f32 to vector<8x128xf32>
    %411 = arith.maximumf %409, %410 : vector<8x128xf32>
    %412 = arith.mulf %171, %339 : vector<8x128xf32>
    %413 = arith.mulf %173, %351 : vector<8x128xf32>
    %414 = arith.addf %412, %413 : vector<8x128xf32>
    %415 = arith.mulf %175, %363 : vector<8x128xf32>
    %416 = arith.addf %414, %415 : vector<8x128xf32>
    %417 = arith.mulf %177, %375 : vector<8x128xf32>
    %418 = arith.addf %416, %417 : vector<8x128xf32>
    %419 = arith.mulf %179, %387 : vector<8x128xf32>
    %420 = arith.addf %418, %419 : vector<8x128xf32>
    %421 = arith.addf %420, %205 : vector<8x128xf32>
    %cst_22 = arith.constant 0.000000e+00 : f32
    %422 = vector.broadcast %cst_22 : f32 to vector<8x128xf32>
    %423 = arith.maximumf %421, %422 : vector<8x128xf32>
    %424 = arith.mulf %181, %339 : vector<8x128xf32>
    %425 = arith.mulf %183, %351 : vector<8x128xf32>
    %426 = arith.addf %424, %425 : vector<8x128xf32>
    %427 = arith.mulf %185, %363 : vector<8x128xf32>
    %428 = arith.addf %426, %427 : vector<8x128xf32>
    %429 = arith.mulf %187, %375 : vector<8x128xf32>
    %430 = arith.addf %428, %429 : vector<8x128xf32>
    %431 = arith.mulf %189, %387 : vector<8x128xf32>
    %432 = arith.addf %430, %431 : vector<8x128xf32>
    %433 = arith.addf %432, %207 : vector<8x128xf32>
    %cst_23 = arith.constant 0.000000e+00 : f32
    %434 = vector.broadcast %cst_23 : f32 to vector<8x128xf32>
    %435 = arith.maximumf %433, %434 : vector<8x128xf32>
    %436 = arith.mulf %191, %339 : vector<8x128xf32>
    %437 = arith.mulf %193, %351 : vector<8x128xf32>
    %438 = arith.addf %436, %437 : vector<8x128xf32>
    %439 = arith.mulf %195, %363 : vector<8x128xf32>
    %440 = arith.addf %438, %439 : vector<8x128xf32>
    %441 = arith.mulf %197, %375 : vector<8x128xf32>
    %442 = arith.addf %440, %441 : vector<8x128xf32>
    %443 = arith.mulf %199, %387 : vector<8x128xf32>
    %444 = arith.addf %442, %443 : vector<8x128xf32>
    %445 = arith.addf %444, %209 : vector<8x128xf32>
    %cst_24 = arith.constant 0.000000e+00 : f32
    %446 = vector.broadcast %cst_24 : f32 to vector<8x128xf32>
    %447 = arith.maximumf %445, %446 : vector<8x128xf32>
    %448 = arith.mulf %211, %399 : vector<8x128xf32>
    %449 = arith.mulf %213, %411 : vector<8x128xf32>
    %450 = arith.addf %448, %449 : vector<8x128xf32>
    %451 = arith.mulf %215, %423 : vector<8x128xf32>
    %452 = arith.addf %450, %451 : vector<8x128xf32>
    %453 = arith.mulf %217, %435 : vector<8x128xf32>
    %454 = arith.addf %452, %453 : vector<8x128xf32>
    %455 = arith.mulf %219, %447 : vector<8x128xf32>
    %456 = arith.addf %454, %455 : vector<8x128xf32>
    %457 = arith.addf %456, %231 : vector<8x128xf32>
    %458 = arith.mulf %221, %399 : vector<8x128xf32>
    %459 = arith.mulf %223, %411 : vector<8x128xf32>
    %460 = arith.addf %458, %459 : vector<8x128xf32>
    %461 = arith.mulf %225, %423 : vector<8x128xf32>
    %462 = arith.addf %460, %461 : vector<8x128xf32>
    %463 = arith.mulf %227, %435 : vector<8x128xf32>
    %464 = arith.addf %462, %463 : vector<8x128xf32>
    %465 = arith.mulf %229, %447 : vector<8x128xf32>
    %466 = arith.addf %464, %465 : vector<8x128xf32>
    %467 = arith.addf %466, %233 : vector<8x128xf32>
    %468 = arith.subf %467, %457 : vector<8x128xf32>
    %cst_25 = arith.constant -3.000000e+01 : f32
    %cst_26 = arith.constant 3.000000e+01 : f32
    %469 = vector.broadcast %cst_25 : f32 to vector<8x128xf32>
    %470 = arith.maximumf %469, %468 : vector<8x128xf32>
    %471 = vector.broadcast %cst_26 : f32 to vector<8x128xf32>
    %472 = arith.minimumf %471, %470 : vector<8x128xf32>
    %473 = math.exp %472 : vector<8x128xf32>
    %cst_27 = arith.constant 1.000000e+00 : f32
    %474 = vector.broadcast %cst_27 : f32 to vector<8x128xf32>
    %475 = arith.addf %474, %473 : vector<8x128xf32>
    %476 = tpu.reciprocal %475 {approx = true} : vector<8x128xf32> -> vector<8x128xf32>
    %c0_28 = arith.constant 0 : index
    %c0_29 = arith.constant 0 : index
    %c0_30 = arith.constant 0 : index
    %477 = vector.load %arg3[%c0_28, %c0_29, %c0_30] : memref<2x8x128xf32, #tpu.memory_space<vmem>>, vector<1x8x128xf32>
    %478 = vector.shape_cast %477 : vector<1x8x128xf32> to vector<8x128xf32>
    %479 = vector.shape_cast %476 : vector<8x128xf32> to vector<1x8x128xf32>
    tpu.vector_store %arg3[%c0_28, %c0_29, %c0_30], %479 {strides = array<i32>} : memref<2x8x128xf32, #tpu.memory_space<vmem>>, vector<1x8x128xf32>,
    %cst_31 = arith.constant 1.000000e+00 : f32
    %480 = vector.broadcast %cst_31 : f32 to vector<8x128xf32>
    %481 = arith.subf %480, %476 : vector<8x128xf32>
    %c1_32 = arith.constant 1 : index
    %c0_33 = arith.constant 0 : index
    %c0_34 = arith.constant 0 : index
    %482 = vector.load %arg3[%c1_32, %c0_33, %c0_34] : memref<2x8x128xf32, #tpu.memory_space<vmem>>, vector<1x8x128xf32>
    %483 = vector.shape_cast %482 : vector<1x8x128xf32> to vector<8x128xf32>
    %484 = vector.shape_cast %481 : vector<8x128xf32> to vector<1x8x128xf32>
    tpu.vector_store %arg3[%c1_32, %c0_33, %c0_34], %484 {strides = array<i32>} : memref<2x8x128xf32, #tpu.memory_space<vmem>>, vector<1x8x128xf32>,
    return
  }
  func.func @transform_0(%arg0: i32) -> i32 {
    %c0_i32 = arith.constant 0 : i32
    %c0_i32_0 = arith.constant 0 : i32
    return %c0_i32 : i32
  }
  func.func @transform_1(%arg0: i32) -> (i32, i32, i32) {
    %c0_i32 = arith.constant 0 : i32
    %c0_i32_0 = arith.constant 0 : i32
    %c0_i32_1 = arith.constant 0 : i32
    return %c0_i32, %arg0, %c0_i32_0 : i32, i32, i32
  }
  func.func @transform_2(%arg0: i32) -> (i32, i32, i32) {
    %c0_i32 = arith.constant 0 : i32
    %c0_i32_0 = arith.constant 0 : i32
    %c0_i32_1 = arith.constant 0 : i32
    return %c0_i32, %arg0, %c0_i32_0 : i32, i32, i32
  }
}

</mosaic_0001>

<bundles_post_ra>
// kernel: _net_forward_impl.1
= control target key start
LH: loop header
LB: loop body
LE: loop exit
PB: predicated region body
PF: predicated region fallthrough
CT: control target
= control target key end

     0   :  { %s1540_s0 = inlined_call_operand.vmem [shape: f32[128], index: 0, kind: input, shape index: {}]   ;;  %s1541_s1 = inlined_call_operand.vmem [shape: f32[2,16,128], index: 1, kind: input, shape index: {}]   ;;  %s1542_s2 = inlined_call_operand.vmem [shape: f32[2,16,128], index: 2, kind: output, shape index: {}]  }
   0x1   :  { %1558 = sst [smem:[#allocation22_spill]] %s1540_s0 }
   0x2   :  { %1559 = sst [smem:[#allocation23_spill]] %s1541_s1 }
   0x3   :  { %1560 = sst [smem:[#allocation24_spill]] %s1542_s2 }
   0x4   :  { %7 = vsyncpa [#allocation3], 0  ;;  %s993_s9 = smov 0   ;;  %s995_s10 = smov 0  }
   0x5   :  { %s997_s11 = smov 0  }
   0x6 LB: > { %1561 = sst [smem:[#allocation7_spill]] %s971_s10  ;;  %s1009_s12 = sadd.s32 4294967295, %s975_s11   ;;  %s975_s11 = sphi %s997_s11, %s1595_s11   ;;  %s971_s10 = sphi %s995_s10, %s1597_s10   ;;  %s967_s9 = sphi %s993_s9, %s1596_s9  }
   0x7   : > { %1562 = sst [smem:[#allocation8_spill]] %s1009_s12  ;;  %s1012_s13 = sadd.s32 1, %s975_s11  }
   0x8   : > { %1563 = sst [smem:[#allocation9_spill]] %s1012_s13  ;;  %s38_s14 = ssub.s32 %s975_s11, %s1012_s13 }
   0x9   : > { %s41_s15 = sadd.s32 1, %s971_s10  ;;  %p39_p0 = scmp.eq.s32.totalorder %s38_s14, 0 }
   0xa   : > { %p48_p1 = scmp.ne.s32.totalorder %s971_s10, %s967_s9  ;;  %p49_p2 = scmp.eq.s32.totalorder %s975_s11, 0 }
   0xb   : > { %p78_p3 = scmp.eq.s32.totalorder %s1009_s12, 1  ;;  %p763_p6 = scmp.ge.s32.totalorder %s975_s11, 1 }
   0xc   : > { %s1022_s16 = scalar_select %p39_p0, %s971_s10, %s41_s15  }
   0xd   : > { %p1024_p4 = por %p49_p2, %p48_p1  ;;  %p1028_p5 = por %p78_p3, %p48_p1 }
   0xe   : > { %1564 = sst [smem:[#allocation10_spill]] %s1022_s16  ;;  %p91_p7 = scmp.lt.s32.totalorder %s975_s11, 3 }
   0xf   : > { %s1566_s18 = scalar_select %p1028_p5, 1, 0 }
  0x10   : > { %p903_p8 = scmp.eq.s32.totalorder %s1009_s12, 0  ;;  %p1035_p9 = pnand %p763_p6, %p91_p7 }
  0x11   : > { %1567 = sst [smem:[#allocation11_spill]] %s1566_s18  ;;  %s1569_s0 = sld [smem:[#allocation22_spill]] }
  0x12   : > { %p899_p10 = pneg %p1035_p9 }
  0x14   : > { %p900_p11 = pnand %p903_p8, %p899_p10 }
  0x16   : > { %p936_p13 = pneg %p900_p11 }
  0x17   : > { %s104_s22 = sshll.u32 %s1569_s0, 4  ;;  %s105_s22 = int_to_ptr.vmem [resolvable:$true] %s104_s22 }
  0x18   : > { %s934_s23 = scalar_lea.vmem %s105_s22, 16  ;;  %p942_p2 = scmp.lt.s32.totalorder %s105_s22, %s105_s22 }
  0x19   : > { %p935_p12 = scmp.ne.s32.totalorder %s105_s22, %s934_s23  ;;  %p943_p3 = scmp.lt.s32.totalorder %s934_s23, %s934_s23 }
  0x1b   : > { %p937_p0 = pnand %p936_p13, %p935_p12  ;;  %p944_p6 = por %p943_p3, %p942_p2 }
  0x1d   : > { %p938_p1 = pneg %p937_p0 }
  0x1f   : > { %p945_p7 = pnand %p944_p6, %p938_p1 }
  0x21   : > { %948 = shalt.err (!%p945_p7)
}
  0x22   : > { %s977_s24 = smov [#allocation2]   ;;  %p765_p5 = scmp.ge.s32.totalorder %s975_s11, 2 }
  0x23   : > { %902 = dma.vmem_to_smem (!%p900_p11), %s105_s22, 16, %s977_s24, [#allocation3]  }
  0x24   : > { %111 = sbr.rel (%p765_p5) target bundleno = 54 (0x36), region = 20 }
  0x2b   : > { %114 = sbr.rel (!%p1024_p4) target bundleno = 54 (0x36), region = 24  ;;  %s116_s25 = sand.u32 (%p1024_p4), 1, %s971_s10  }
  0x2c   : > { %s767_s26 = sshll.u32 (%p1024_p4), %s975_s11, 3  ;;  %s766_s27 = sshll.u32 (%p1024_p4), %s116_s25, 4 }
  0x2d   : > { %s1570_s1 = sld [smem:[#allocation23_spill]] (%p1024_p4)  ;;  %s118_s3 = scalar_lea.vmem (%p1024_p4), [#allocation4], %s766_s27 }
  0x33   : > { %s120_s30 = scalar_lea.vmem %s1570_s1, %s767_s26 }
  0x34   : > { %v150_v0 = vld [vmem:[%s120_s30] sm:$0xff]  ;;  %v152_v1 = vld [vmem:[%s120_s30 + $0x10] sm:$0xff] }
  0x35   : > { %151 = vst [vmem:[%s118_s3] sm:$0xff] %v150_v0  ;;  %153 = vst [vmem:[%s118_s3 + $0x8] sm:$0xff] %v152_v1 }
  0x36 PF: > { %162 = sbr.rel (%p1035_p9) target bundleno = 203 (0xcb), region = 62 }
  0x3d   : > { %962 = dma.done.wait (%p903_p8), [#allocation3], 16  }
  0x3e   : > { %964 = vsyncadd (%p903_p8), [#allocation3], 4294967280  ;;  %s169_s4 = sand.u32 1, %s967_s9  }
  0x3f   : > { %s1061_s5 = sshll.u32 %s169_s4, 4 }
  0x40   : > { %1571 = sst [smem:[#allocation12_spill]] %s1061_s5  ;;  %s171_s6 = scalar_lea.vmem [#allocation4], %s1061_s5 }
  0x41   : > { %175 = sfence }
  0x42   : > { %s190_s7 = sld [smem:[#allocation2]]  ;;  %s772_s8 = sld [smem:[#allocation2 + $0x1]]  ;;  %v424_v2 = vld [vmem:[%s171_s6] sm:$0xff]  ;;  %v888_v3 = vld [vmem:[%s171_s6 + $0x8] sm:$0xff] }
  0x43   : > { %s773_s11 = sld [smem:[#allocation2 + $0x2]]  ;;  %s774_s14 = sld [smem:[#allocation2 + $0x3]] }
  0x44   : > { %s775_s15 = sld [smem:[#allocation2 + $0x4]]  ;;  %s776_s17 = sld [smem:[#allocation2 + $0x5]] }
  0x45   : > { %s1064_s19 = sld [smem:[#allocation2 + $0x6]]  ;;  %s1066_s20 = sld [smem:[#allocation2 + $0x7]] }
  0x46   : > { %s1068_s21 = sld [smem:[#allocation2 + $0x8]]  ;;  %s1070_s22 = sld [smem:[#allocation2 + $0x9]] }
  0x47   : > { %s1072_s9 = sld [smem:[#allocation2 + $0xa]]  ;;  %s1074_s23 = sld [smem:[#allocation2 + $0xb]] }
  0x48   : > { %v191_v4 = vstv %s190_s7  ;;  %s1076_s24 = sld [smem:[#allocation2 + $0xc]]  ;;  %v193_v5 = vstv %s772_s8  ;;  %s1078_s25 = sld [smem:[#allocation2 + $0xd]] }
  0x49   : > { %v195_v6 = vstv %s773_s11  ;;  %v427_v7 = vmul.f32 %v424_v2, %v191_v4  ;;  %v197_v8 = vstv %s774_s14  ;;  %s1080_s26 = sld [smem:[#allocation2 + $0xf]]  ;;  %s1082_s27 = sld [smem:[#allocation2 + $0x10]]  ;;  %v428_v10 = vmul.f32 %v888_v3, %v193_v5 }
  0x4a   : > { %v199_v9 = vstv %s775_s15  ;;  %v432_v11 = vmul.f32 %v424_v2, %v195_v6  ;;  %v201_v12 = vstv %s776_s17  ;;  %s1085_s28 = sld [smem:[#allocation2 + $0x11]]  ;;  %v433_v14 = vmul.f32 %v888_v3, %v197_v8  ;;  %s1088_s29 = sld [smem:[#allocation2 + $0xe]] }
  0x4b   : > { %v203_v13 = vstv %s1064_s19  ;;  %v437_v15 = vmul.f32 %v424_v2, %v199_v9  ;;  %v205_v16 = vstv %s1066_s20  ;;  %v429_v17 = vadd.f32 %v428_v10, %v427_v7  ;;  %s1091_s30 = sld [smem:[#allocation2 + $0x14]]  ;;  %s1095_s3 = sld [smem:[#allocation2 + $0x15]] }
  0x4c   : > { %v438_v18 = vmul.f32 %v888_v3, %v201_v12  ;;  %v434_v20 = vadd.f32 %v433_v14, %v432_v11  ;;  %v442_v21 = vmul.f32 %v424_v2, %v203_v13  ;;  %v207_v26 = vstv %s1068_s21  ;;  %s1098_s4 = sld [smem:[#allocation2 + $0x12]]  ;;  %s1100_s6 = sld [smem:[#allocation2 + $0x16]] }
  0x4d   : > { %v211_v19 = vstv %s1072_s9  ;;  %v213_v22 = vstv %s1074_s23  ;;  %v443_v28 = vmul.f32 %v888_v3, %v205_v16  ;;  %v209_v29 = vstv %s1070_s22  ;;  %s1108_s7 = sld [smem:[#allocation2 + $0x17]]  ;;  %s1112_s8 = sld [smem:[#allocation2 + $0x13]] }
  0x4e   : > { %v215_v23 = vstv %s1076_s24  ;;  %v430_v24 = vadd.f32 %v429_v17, %v211_v19  ;;  %v439_v25 = vadd.f32 %v438_v18, %v437_v15  ;;  %v435_v27 = vadd.f32 %v434_v20, %v213_v22  ;;  %s1117_s11 = sld [smem:[#allocation2 + $0x19]]  ;;  %s1119_s14 = sld [smem:[#allocation2 + $0x1a]] }
  0x4f   : > { %v217_v30 = vstv %s1078_s25  ;;  %v221_v33 = vstv %s1080_s26  ;;  %v223_v34 = vstv %s1082_s27  ;;  %v444_v36 = vadd.f32 %v443_v28, %v442_v21  ;;  %s1122_s15 = sld [smem:[#allocation2 + $0x18]]  ;;  %s1127_s17 = sld [smem:[#allocation2 + $0x1b]] }
  0x50   : > { %v1104_v31 = vmax.f32 %v430_v24, 0.0  ;;  %v440_v32 = vadd.f32 %v439_v25, %v215_v23  ;;  %v1110_v35 = vmax.f32 %v435_v27, 0.0  ;;  %v447_v38 = vmul.f32 %v424_v2, %v207_v26  ;;  %s1130_s19 = sld [smem:[#allocation2 + $0x1c]]  ;;  %s1137_s20 = sld [smem:[#allocation2 + $0x1d]] }
  0x51   : > { %v225_v39 = vstv %s1085_s28  ;;  %v445_v40 = vadd.f32 %v444_v36, %v217_v30  ;;  %v448_v41 = vmul.f32 %v888_v3, %v209_v29  ;;  %v219_v42 = vstv %s1088_s29  ;;  %s1139_s21 = sld [smem:[#allocation2 + $0x1e]]  ;;  %s1141_s22 = sld [smem:[#allocation2 + $0x1f]] }
  0x52   : > { %v1114_v37 = vmax.f32 %v440_v32, 0.0  ;;  %v452_v43 = vmul.f32 %v1104_v31, %v221_v33  ;;  %v453_v44 = vmul.f32 %v1110_v35, %v223_v34  ;;  %v231_v45 = vstv %s1091_s30  ;;  %s1143_s9 = sld [smem:[#allocation2 + $0x20]]  ;;  %s1147_s23 = sld [smem:[#allocation2 + $0x21]] }
  0x53   : > { %v449_v46 = vadd.f32 %v448_v41, %v447_v38  ;;  %v233_v47 = vstv %s1095_s3  ;;  %v1132_v48 = vmax.f32 %v445_v40, 0.0  ;;  %v227_v51 = vstv %s1098_s4  ;;  %s1149_s24 = sld [smem:[#allocation2 + $0x22]]  ;;  %s1152_s25 = sld [smem:[#allocation2 + $0x23]] }
  0x54   : > { %v454_v49 = vadd.f32 %v453_v44, %v452_v43  ;;  %v455_v50 = vmul.f32 %v1114_v37, %v225_v39  ;;  %v235_v52 = vstv %s1100_s6  ;;  %v463_v54 = vmul.f32 %v1104_v31, %v231_v45  ;;  %s1154_s26 = sld [smem:[#allocation2 + $0x24]]  ;;  %s1163_s27 = sld [smem:[#allocation2 + $0x25]] }
  0x55   : > { %v450_v53 = vadd.f32 %v449_v46, %v219_v42  ;;  %v237_v55 = vstv %s1108_s7  ;;  %v464_v56 = vmul.f32 %v1110_v35, %v233_v47  ;;  %v457_v59 = vmul.f32 %v1132_v48, %v227_v51  ;;  %s1165_s28 = sld [smem:[#allocation2 + $0x28]]  ;;  %s1168_s29 = sld [smem:[#allocation2 + $0x26]] }
  0x56   : > { %v456_v58 = vadd.f32 %v455_v50, %v454_v49  ;;  %v466_v60 = vmul.f32 %v1114_v37, %v235_v52  ;;  %v229_v61 = vstv %s1112_s8  ;;  %v241_v62 = vstv %s1117_s11  ;;  %s1170_s30 = sld [smem:[#allocation2 + $0x29]]  ;;  %s1174_s3 = sld [smem:[#allocation2 + $0x27]] }
  0x57   : > { %v1156_v57 = vmax.f32 %v450_v53, 0.0  ;;  %v243_v63 = vstv %s1119_s14  ;;  %v465_v0 = vadd.f32 %v464_v56, %v463_v54  ;;  %v239_v1 = vstv %s1122_s15  ;;  %s1176_s4 = sld [smem:[#allocation2 + $0x2a]]  ;;  %s1178_s6 = sld [smem:[#allocation2 + $0x2b]] }
  0x58   : > { %v468_v2 = vmul.f32 %v1132_v48, %v237_v55  ;;  %v245_v3 = vstv %s1127_s17  ;;  %v458_v5 = vadd.f32 %v457_v59, %v456_v58  ;;  %v474_v7 = vmul.f32 %v1104_v31, %v241_v62  ;;  %s1184_s7 = sld [smem:[#allocation2 + $0x2c]]  ;;  %s1186_s8 = sld [smem:[#allocation2 + $0x2d]] }
  0x59   : > { %v467_v4 = vadd.f32 %v466_v60, %v465_v0  ;;  %v459_v6 = vmul.f32 %v1156_v57, %v229_v61  ;;  %v475_v8 = vmul.f32 %v1110_v35, %v243_v63  ;;  %v247_v9 = vstv %s1130_s19  ;;  %s1191_s11 = sld [smem:[#allocation2 + $0x2e]]  ;;  %s1193_s14 = sld [smem:[#allocation2 + $0x2f]] }
  0x5a   : > { %v470_v11 = vmul.f32 %v1156_v57, %v239_v1  ;;  %v249_v12 = vstv %s1137_s20  ;;  %v251_v13 = vstv %s1139_s21  ;;  %v477_v15 = vmul.f32 %v1114_v37, %v245_v3  ;;  %s1200_s15 = sld [smem:[#allocation2 + $0x30]]  ;;  %s1203_s17 = sld [smem:[#allocation2 + $0x31]] }
  0x5b   : > { %v469_v10 = vadd.f32 %v468_v2, %v467_v4  ;;  %v476_v14 = vadd.f32 %v475_v8, %v474_v7  ;;  %v253_v16 = vstv %s1141_s22  ;;  %v255_v17 = vstv %s1143_s9  ;;  %s1205_s19 = sld [smem:[#allocation2 + $0x32]]  ;;  %s1210_s20 = sld [smem:[#allocation2 + $0x33]] }
  0x5c   : > { %v257_v18 = vstv %s1147_s23  ;;  %v259_v19 = vstv %s1149_s24  ;;  %v261_v20 = vstv %s1152_s25  ;;  %v460_v21 = vadd.f32 %v459_v6, %v458_v5  ;;  %s1212_s21 = sld [smem:[#allocation2 + $0x34]]  ;;  %s1217_s22 = sld [smem:[#allocation2 + $0x35]] }
  0x5d   : > { %v478_v22 = vadd.f32 %v477_v15, %v476_v14  ;;  %v479_v23 = vmul.f32 %v1132_v48, %v247_v9  ;;  %v263_v24 = vstv %s1154_s26  ;;  %v271_v25 = vstv %s1165_s28  ;;  %s1219_s9 = sld [smem:[#allocation2 + $0x36]]  ;;  %s1225_s23 = sld [smem:[#allocation2 + $0x37]] }
  0x5e   : > { %v471_v26 = vadd.f32 %v470_v11, %v469_v10  ;;  %v481_v27 = vmul.f32 %v1156_v57, %v249_v12  ;;  %v265_v28 = vstv %s1163_s27  ;;  %v273_v29 = vstv %s1170_s30  ;;  %s1227_s24 = sld [smem:[#allocation2 + $0x38]]  ;;  %s1231_s25 = sld [smem:[#allocation2 + $0x39]] }
  0x5f   : > { %v480_v30 = vadd.f32 %v479_v23, %v478_v22  ;;  %v485_v32 = vmul.f32 %v1104_v31, %v251_v13  ;;  %v267_v33 = vstv %s1168_s29  ;;  %v269_v34 = vstv %s1174_s3  ;;  %s1233_s26 = sld [smem:[#allocation2 + $0x3a]]  ;;  %s1237_s27 = sld [smem:[#allocation2 + $0x3b]] }
  0x60   : > { %v275_v36 = vstv %s1176_s4  ;;  %v486_v38 = vmul.f32 %v1110_v35, %v253_v16  ;;  %v277_v39 = vstv %s1178_s6  ;;  %v461_v40 = vadd.f32 %v460_v21, %v271_v25  ;;  %s1239_s28 = sld [smem:[#allocation2 + $0x3c]]  ;;  %s1245_s29 = sld [smem:[#allocation2 + $0x3d]] }
  0x61   : > { %v482_v41 = vadd.f32 %v481_v27, %v480_v30  ;;  %v488_v42 = vmul.f32 %v1114_v37, %v255_v17  ;;  %v279_v43 = vstv %s1184_s7  ;;  %v472_v44 = vadd.f32 %v471_v26, %v273_v29  ;;  %s1247_s30 = sld [smem:[#allocation2 + $0x3e]]  ;;  %s1250_s3 = sld [smem:[#allocation2 + $0x3f]] }
  0x62   : > { %v487_v45 = vadd.f32 %v486_v38, %v485_v32  ;;  %v490_v46 = vmul.f32 %v1132_v48, %v257_v18  ;;  %v281_v47 = vstv %s1186_s8  ;;  %v283_v49 = vstv %s1191_s11  ;;  %s1252_s4 = sld [smem:[#allocation2 + $0x40]]  ;;  %s1258_s6 = sld [smem:[#allocation2 + $0x41]] }
  0x63   : > { %v285_v50 = vstv %s1193_s14  ;;  %v483_v51 = vadd.f32 %v482_v41, %v275_v36  ;;  %v287_v52 = vstv %s1200_s15  ;;  %v492_v54 = vmul.f32 %v1156_v57, %v259_v19  ;;  %s1260_s8 = sld [smem:[#allocation2 + $0x42]]  ;;  %s1266_s11 = sld [smem:[#allocation2 + $0x43]] }
  0x64   : > { %v489_v53 = vadd.f32 %v488_v42, %v487_v45  ;;  %v496_v55 = vmul.f32 %v1104_v31, %v261_v20  ;;  %v289_v56 = vstv %s1203_s17  ;;  %v291_v58 = vstv %s1205_s19  ;;  %s1268_s14 = sld [smem:[#allocation2 + $0x44]]  ;;  %s1274_s19 = sld [smem:[#allocation2 + $0x45]] }
  0x65   : > { %1572 = sst [smem:[#allocation13_spill]] %s1237_s27  ;;  %v1262_v59 = vmax.f32 %v461_v40, 0.0  ;;  %v497_v60 = vmul.f32 %v1110_v35, %v263_v24  ;;  %v293_v61 = vstv %s1210_s20  ;;  %v1270_v31 = vmax.f32 %v472_v44, 0.0  ;;  %s1284_s20 = sld [smem:[#allocation2 + $0x47]] }
  0x66   : > { %1573 = sst [smem:[#allocation14_spill]] %s1239_s28  ;;  %v491_v62 = vadd.f32 %v490_v46, %v489_v53  ;;  %v499_v63 = vmul.f32 %v1114_v37, %v265_v28  ;;  %v295_v0 = vstv %s1212_s21  ;;  %s1276_s0 = sld [smem:[#allocation2 + $0x46]]  ;;  %v1278_v1 = vmax.f32 %v483_v51, 0.0 }
  0x67   : > { %1574 = sst [smem:[#allocation15_spill]] %s1245_s29  ;;  %v498_v35 = vadd.f32 %v497_v60, %v496_v55  ;;  %v501_v2 = vmul.f32 %v1132_v48, %v267_v33  ;;  %v297_v3 = vstv %s1217_s22  ;;  %v299_v4 = vstv %s1219_s9  ;;  %s1289_s21 = sld [smem:[#allocation2 + $0x49]] }
  0x68   : > { %1575 = sst [smem:[#allocation16_spill]] %s1247_s30  ;;  %v301_v5 = vstv %s1225_s23  ;;  %s1286_s1 = sld [smem:[#allocation2 + $0x48]]  ;;  %v493_v37 = vadd.f32 %v492_v54, %v491_v62  ;;  %v303_v6 = vstv %s1227_s24  ;;  %v503_v48 = vmul.f32 %v1156_v57, %v269_v34 }
  0x69   : > { %1576 = sst [smem:[#allocation17_spill]] %s1250_s3  ;;  %v500_v7 = vadd.f32 %v499_v63, %v498_v35  ;;  %v507_v8 = vmul.f32 %v1262_v59, %v281_v47  ;;  %v305_v9 = vstv %s1231_s25  ;;  %v307_v10 = vstv %s1233_s26  ;;  %s1297_s10 = sld [smem:[#allocation2 + $0x4b]] }
  0x6a   : > { %1577 = sst [smem:[#allocation18_spill]] %s1252_s4  ;;  %s1291_s16 = sld [smem:[#allocation2 + $0x4a]]  ;;  %v494_v11 = vadd.f32 %v493_v37, %v277_v39  ;;  %v508_v12 = vmul.f32 %v1270_v31, %v283_v49  ;;  %v309_v13 = vstv %s1237_s27  ;;  %v311_v14 = vstv %s1239_s28 }
  0x6b   : > { %1578 = sst [smem:[#allocation19_spill]] %s1266_s11  ;;  %s1304_s2 = sld [smem:[#allocation2 + $0x4d]]  ;;  %v502_v57 = vadd.f32 %v501_v2, %v500_v7  ;;  %v510_v15 = vmul.f32 %v1278_v1, %v285_v50  ;;  %v313_v16 = vstv %s1245_s29  ;;  %v315_v17 = vstv %s1247_s30 }
  0x6c   : > { %1579 = sst [smem:[#allocation20_spill]] %s1268_s14  ;;  %s1299_s13 = sld [smem:[#allocation2 + $0x4c]]  ;;  %v1315_v18 = vmax.f32 %v494_v11, 0.0  ;;  %v509_v19 = vadd.f32 %v508_v12, %v507_v8  ;;  %v317_v20 = vstv %s1250_s3  ;;  %v319_v21 = vstv %s1252_s4 }
  0x6d   : > { %1580 = sst [smem:[#allocation21_spill]] %s1289_s21  ;;  %s1311_s18 = sld [smem:[#allocation2 + $0x4f]]  ;;  %v504_v22 = vadd.f32 %v503_v48, %v502_v57  ;;  %v518_v23 = vmul.f32 %v1262_v59, %v291_v58  ;;  %v321_v24 = vstv %s1258_s6  ;;  %v323_v25 = vstv %s1260_s8 }
  0x6e   : > { %s1306_s12 = sld [smem:[#allocation2 + $0x4e]]  ;;  %s1313_s5 = sld [smem:[#allocation2 + $0x50]]  ;;  %v511_v26 = vadd.f32 %v510_v15, %v509_v19  ;;  %v512_v27 = vmul.f32 %v1315_v18, %v287_v52  ;;  %v325_v28 = vstv %s1266_s11  ;;  %v327_v29 = vstv %s1268_s14 }
  0x6f   : > { %s1319_s28 = sld [smem:[#allocation2 + $0x51]]  ;;  %s1321_s27 = sld [smem:[#allocation2 + $0x52]]  ;;  %v505_v30 = vadd.f32 %v504_v22, %v279_v43  ;;  %v519_v32 = vmul.f32 %v1270_v31, %v293_v61  ;;  %v329_v33 = vstv %s1274_s19  ;;  %v331_v34 = vstv %s1276_s0 }
  0x70   : > { %s1326_s30 = sld [smem:[#allocation2 + $0x53]]  ;;  %s1328_s29 = sld [smem:[#allocation2 + $0x54]]  ;;  %v333_v36 = vstv %s1284_s20  ;;  %v521_v38 = vmul.f32 %v1278_v1, %v295_v0  ;;  %v335_v39 = vstv %s1286_s1  ;;  %v513_v41 = vadd.f32 %v512_v27, %v511_v26 }
  0x71   : > { %s1335_s4 = sld [smem:[#allocation2 + $0x55]]  ;;  %s1337_s3 = sld [smem:[#allocation2 + $0x56]]  ;;  %v1355_v40 = vmax.f32 %v505_v30, 0.0  ;;  %v520_v42 = vadd.f32 %v519_v32, %v518_v23  ;;  %v337_v43 = vstv %s1289_s21  ;;  %v339_v44 = vstv %s1291_s16 }
  0x72   : > { %s1345_s15 = sld [smem:[#allocation2 + $0x57]]  ;;  %s1347_s14 = sld [smem:[#allocation2 + $0x58]]  ;;  %v523_v45 = vmul.f32 %v1315_v18, %v297_v3  ;;  %v529_v46 = vmul.f32 %v1262_v59, %v301_v5  ;;  %v341_v47 = vstv %s1297_s10  ;;  %v343_v49 = vstv %s1299_s13 }
  0x73   : > { %s1351_s7 = sld [smem:[#allocation2 + $0x59]]  ;;  %s1353_s11 = sld [smem:[#allocation2 + $0x5a]]  ;;  %v514_v50 = vmul.f32 %v1355_v40, %v289_v56  ;;  %v522_v51 = vadd.f32 %v521_v38, %v520_v42  ;;  %v345_v52 = vstv %s1304_s2  ;;  %v525_v54 = vmul.f32 %v1355_v40, %v299_v4 }
  0x74   : > { %s1359_s0 = sld [smem:[#allocation2 + $0x5b]]  ;;  %s1361_s1 = sld [smem:[#allocation2 + $0x5c]]  ;;  %v347_v53 = vstv %s1306_s12  ;;  %v530_v55 = vmul.f32 %v1270_v31, %v303_v6  ;;  %v349_v58 = vstv %s1311_s18  ;;  %v351_v60 = vstv %s1313_s5 }
  0x75   : > { %s1371_s20 = sld [smem:[#allocation2 + $0x5d]]  ;;  %s1373_s21 = sld [smem:[#allocation2 + $0x5e]]  ;;  %v515_v56 = vadd.f32 %v514_v50, %v513_v41  ;;  %v524_v61 = vadd.f32 %v523_v45, %v522_v51  ;;  %v353_v62 = vstv %s1319_s28  ;;  %v355_v63 = vstv %s1321_s27 }
  0x76   : > { %s1380_s22 = sld [smem:[#allocation2 + $0x5f]]  ;;  %s1390_s10 = sld [smem:[#allocation2 + $0x60]]  ;;  %v531_v0 = vadd.f32 %v530_v55, %v529_v46  ;;  %v532_v35 = vmul.f32 %v1278_v1, %v305_v9  ;;  %v357_v2 = vstv %s1326_s30  ;;  %v359_v3 = vstv %s1328_s29 }
  0x77   : > { %s1392_s13 = sld [smem:[#allocation2 + $0x61]]  ;;  %v361_v4 = vstv %s1335_s4  ;;  %v526_v5 = vadd.f32 %v525_v54, %v524_v61  ;;  %v363_v37 = vstv %s1337_s3  ;;  %v516_v6 = vadd.f32 %v515_v56, %v331_v34  ;;  %s1426_s28 = sld [smem:[#allocation2 + $0x62]] }
  0x78   : > { %v533_v7 = vadd.f32 %v532_v35, %v531_v0  ;;  %v534_v48 = vmul.f32 %v1315_v18, %v307_v10  ;;  %v365_v8 = vstv %s1345_s15  ;;  %v367_v11 = vstv %s1347_s14  ;;  %s1449_s3 = sld [smem:[#allocation2 + $0x63]]  ;;  %s1451_s4 = sld [smem:[#allocation2 + $0x64]] }
  0x79   : > { %v369_v9 = vstv %s1351_s7  ;;  %v527_v12 = vadd.f32 %v526_v5, %v333_v36  ;;  %v371_v57 = vstv %s1353_s11  ;;  %v536_v22 = vmul.f32 %v1355_v40, %v309_v13  ;;  %s1453_s6 = sld [smem:[#allocation2 + $0x65]]  ;;  %s1460_s11 = sld [smem:[#allocation2 + $0x66]] }
  0x7a   : > { %v373_v15 = vstv %s1359_s0  ;;  %v535_v19 = vadd.f32 %v534_v48, %v533_v7  ;;  %v375_v23 = vstv %s1361_s1  ;;  %v540_v27 = vmul.f32 %v1262_v59, %v311_v14  ;;  %s1463_s19 = sld [smem:[#allocation2 + $0x67]]  ;;  %s1465_s15 = sld [smem:[#allocation2 + $0x68]] }
  0x7b   : > { %v377_v26 = vstv %s1371_s20  ;;  %v379_v10 = vstv %s1373_s21  ;;  %v517_v30 = vmax.f32 %v516_v6, 0.0  ;;  %v528_v32 = vmax.f32 %v527_v12, 0.0  ;;  %s1469_s2 = sld [smem:[#allocation2 + $0x69]]  ;;  %s1471_s0 = sld [smem:[#allocation2 + $0x6a]] }
  0x7c   : > { %v537_v34 = vadd.f32 %v536_v22, %v535_v19  ;;  %v541_v36 = vmul.f32 %v1270_v31, %v313_v16  ;;  %v381_v38 = vstv %s1380_s22  ;;  %v383_v13 = vstv %s1390_s10  ;;  %s1473_s1 = sld [smem:[#allocation2 + $0x6b]]  ;;  %s1478_s22 = sld [smem:[#allocation2 + $0x6e]] }
  0x7d   : > { %v385_v41 = vstv %s1392_s13  ;;  %v543_v42 = vmul.f32 %v1278_v1, %v315_v17  ;;  %v545_v14 = vmul.f32 %v1315_v18, %v317_v20  ;;  %v551_v50 = vmul.f32 %v1262_v59, %v321_v24  ;;  %s1482_s10 = sld [smem:[#allocation2 + $0x6f]]  ;;  %s1484_s13 = sld [smem:[#allocation2 + $0x70]] }
  0x7e   : > { %v538_v45 = vadd.f32 %v537_v34, %v335_v39  ;;  %v542_v46 = vadd.f32 %v541_v36, %v540_v27  ;;  %v547_v51 = vmul.f32 %v1355_v40, %v319_v21  ;;  %v552_v16 = vmul.f32 %v1270_v31, %v323_v25  ;;  %s1495_s16 = sld [smem:[#allocation2 + $0x6c]]  ;;  %s1497_s17 = sld [smem:[#allocation2 + $0x71]] }
  0x7f   : > { %v554_v54 = vmul.f32 %v1278_v1, %v325_v28  ;;  %v556_v17 = vmul.f32 %v1315_v18, %v327_v29  ;;  %v562_v55 = vmul.f32 %v517_v30, %v341_v47  ;;  %v563_v59 = vmul.f32 %v528_v32, %v343_v49  ;;  %s1509_s12 = sld [smem:[#allocation2 + $0x6d]]  ;;  %s1511_s30 = sld [smem:[#allocation2 + $0x72]] }
  0x80   : > { %v539_v20 = vmax.f32 %v538_v45, 0.0  ;;  %v544_v39 = vadd.f32 %v543_v42, %v542_v46  ;;  %v553_v21 = vadd.f32 %v552_v16, %v551_v50  ;;  %v573_v24 = vmul.f32 %v517_v30, %v351_v60  ;;  %s886_s18 = sld [smem:[#allocation2 + $0x73]]  ;;  %s887_s29 = sld [smem:[#allocation2 + $0x74]] }
  0x81   : > { %v574_v31 = vmul.f32 %v528_v32, %v353_v62  ;;  %v584_v25 = vmul.f32 %v517_v30, %v361_v4  ;;  %v558_v28 = vmul.f32 %v1355_v40, %v329_v33  ;;  %v564_v18 = vadd.f32 %v563_v59, %v562_v55  ;;  %s1590_s14 = sld [smem:[#allocation12_spill]]  ;;  %s1591_s7 = sld [smem:[#allocation11_spill]] }
  0x82   : > { %v546_v1 = vadd.f32 %v545_v14, %v544_v39  ;;  %v565_v29 = vmul.f32 %v539_v20, %v345_v52  ;;  %v555_v47 = vadd.f32 %v554_v54, %v553_v21  ;;  %v576_v56 = vmul.f32 %v539_v20, %v355_v63 }
  0x83   : > { %v575_v49 = vadd.f32 %v574_v31, %v573_v24  ;;  %v585_v61 = vmul.f32 %v528_v32, %v363_v37  ;;  %v587_v35 = vmul.f32 %v539_v20, %v365_v8  ;;  %v595_v60 = vmul.f32 %v517_v30, %v371_v57 }
  0x84   : > { %v548_v0 = vadd.f32 %v547_v51, %v546_v1  ;;  %v596_v5 = vmul.f32 %v528_v32, %v373_v15  ;;  %v387_v62 = vstv %s1426_s28  ;;  %v557_v4 = vadd.f32 %v556_v17, %v555_v47 }
  0x85   : > { %v586_v6 = vadd.f32 %v585_v61, %v584_v25  ;;  %v598_v7 = vmul.f32 %v539_v20, %v375_v23  ;;  %v606_v52 = vmul.f32 %v517_v30, %v381_v38  ;;  %v607_v63 = vmul.f32 %v528_v32, %v383_v13 }
  0x86   : > { %v549_v33 = vadd.f32 %v548_v0, %v337_v43  ;;  %v597_v40 = vadd.f32 %v596_v5, %v595_v60  ;;  %v559_v37 = vadd.f32 %v558_v28, %v557_v4  ;;  %v566_v48 = vadd.f32 %v565_v29, %v564_v18 }
  0x87   : > { %v577_v8 = vadd.f32 %v576_v56, %v575_v49  ;;  %v609_v12 = vmul.f32 %v539_v20, %v385_v41  ;;  %v588_v57 = vadd.f32 %v587_v35, %v586_v6  ;;  %v608_v19 = vadd.f32 %v607_v63, %v606_v52  ;;  %s189_s21 = scalar_lea.vmem [#allocation5], %s1590_s14  ;;  %p1592_p4 = scmp.ne.s32.totalorder %s1591_s7, 0 }
  0x88   : > { %v550_v43 = vmax.f32 %v549_v33, 0.0  ;;  %v599_v15 = vadd.f32 %v598_v7, %v597_v40  ;;  %v389_v22 = vstv %s1449_s3  ;;  %v391_v23 = vstv %s1451_s4  ;;  %s1593_s20 = sld [smem:[#allocation8_spill]] (%p1592_p4)  ;;  %s1594_s24 = sld [smem:[#allocation24_spill]] (%p1592_p4) }
  0x89   : > { %v393_v27 = vstv %s1453_s6  ;;  %v560_v30 = vadd.f32 %v559_v37, %v339_v44  ;;  %v395_v13 = vstv %s1460_s11  ;;  %v610_v41 = vadd.f32 %v609_v12, %v608_v19 }
  0x8a   : > { %v567_v32 = vmul.f32 %v550_v43, %v347_v53  ;;  %v578_v34 = vmul.f32 %v550_v43, %v357_v2  ;;  %v589_v36 = vmul.f32 %v550_v43, %v367_v11  ;;  %v600_v38 = vmul.f32 %v550_v43, %v377_v26 }
  0x8b   : > { %v561_v44 = vmax.f32 %v560_v30, 0.0  ;;  %v611_v42 = vmul.f32 %v550_v43, %v387_v62  ;;  %v397_v51 = vstv %s1463_s19  ;;  %v399_v16 = vstv %s1465_s15 }
  0x8c   : > { %v568_v45 = vadd.f32 %v567_v32, %v566_v48  ;;  %v579_v53 = vadd.f32 %v578_v34, %v577_v8  ;;  %v590_v46 = vadd.f32 %v589_v36, %v588_v57  ;;  %v601_v2 = vadd.f32 %v600_v38, %v599_v15 }
  0x8d   : > { %v569_v11 = vmul.f32 %v561_v44, %v349_v58  ;;  %v580_v26 = vmul.f32 %v561_v44, %v359_v3  ;;  %v591_v14 = vmul.f32 %v561_v44, %v369_v9  ;;  %v602_v50 = vmul.f32 %v561_v44, %v379_v10 }
  0x8e   : > { %v612_v54 = vadd.f32 %v611_v42, %v610_v41  ;;  %v613_v17 = vmul.f32 %v561_v44, %v389_v22  ;;  %v401_v3 = vstv %s1469_s2  ;;  %v403_v9 = vstv %s1471_s0  ;;  %s892_s5 = sshll.u32 (%p1592_p4), %s1593_s20, 3 }
  0x8f   : > { %v570_v20 = vadd.f32 %v569_v11, %v568_v45  ;;  %v581_v58 = vadd.f32 %v580_v26, %v579_v53  ;;  %v592_v39 = vadd.f32 %v591_v14, %v590_v46  ;;  %v603_v55 = vadd.f32 %v602_v50, %v601_v2  ;;  %s656_s25 = scalar_lea.vmem (%p1592_p4), %s1594_s24, %s892_s5 }
  0x90   : > { %v405_v10 = vstv %s1473_s1  ;;  %v614_v59 = vadd.f32 %v613_v17, %v612_v54  ;;  %v411_v1 = vstv %s1478_s22  ;;  %v413_v28 = vstv %s1482_s10 }
  0x91   : > { %v571_v21 = vadd.f32 %v570_v20, %v391_v23  ;;  %v582_v24 = vadd.f32 %v581_v58, %v393_v27  ;;  %v593_v31 = vadd.f32 %v592_v39, %v395_v13  ;;  %v604_v25 = vadd.f32 %v603_v55, %v397_v51 }
  0x92   : > { %v415_v18 = vstv %s1484_s13  ;;  %v615_v29 = vadd.f32 %v614_v59, %v399_v16  ;;  %v407_v0 = vstv %s1495_s16  ;;  %v417_v35 = vstv %s1497_s17 }
  0x93   : > { %v572_v47 = vmax.f32 %v571_v21, 0.0  ;;  %v583_v49 = vmax.f32 %v582_v24, 0.0  ;;  %v594_v56 = vmax.f32 %v593_v31, 0.0  ;;  %v605_v61 = vmax.f32 %v604_v25, 0.0 }
  0x94   : > { %v616_v60 = vmax.f32 %v615_v29, 0.0  ;;  %v409_v6 = vstv %s1509_s12  ;;  %v419_v52 = vstv %s1511_s30  ;;  %v421_v22 = vstv %s886_s18 }
  0x95   : > { %v617_v5 = vmul.f32 %v572_v47, %v401_v3  ;;  %v618_v62 = vmul.f32 %v583_v49, %v403_v9  ;;  %v620_v4 = vmul.f32 %v594_v56, %v405_v10  ;;  %v627_v7 = vmul.f32 %v572_v47, %v411_v1 }
  0x96   : > { %v628_v33 = vmul.f32 %v583_v49, %v413_v28  ;;  %v630_v40 = vmul.f32 %v594_v56, %v415_v18  ;;  %v622_v37 = vmul.f32 %v605_v61, %v407_v0  ;;  %v632_v8 = vmul.f32 %v605_v61, %v417_v35 }
  0x97   : > { %v619_v63 = vadd.f32 %v618_v62, %v617_v5  ;;  %v624_v43 = vmul.f32 %v616_v60, %v409_v6  ;;  %v634_v15 = vmul.f32 %v616_v60, %v419_v52  ;;  %v423_v27 = vstv %s887_s29 }
  0x98   : > { %v629_v48 = vadd.f32 %v628_v33, %v627_v7 }
  0x99   : > { %v621_v12 = vadd.f32 %v620_v4, %v619_v63 }
  0x9a   : > { %v631_v57 = vadd.f32 %v630_v40, %v629_v48 }
  0x9b   : > { %v623_v19 = vadd.f32 %v622_v37, %v621_v12 }
  0x9c   : > { %v633_v23 = vadd.f32 %v632_v8, %v631_v57 }
  0x9d   : > { %v625_v30 = vadd.f32 %v624_v43, %v623_v19 }
  0x9e   : > { %v635_v32 = vadd.f32 %v634_v15, %v633_v23 }
  0x9f   : > { %v626_v34 = vadd.f32 %v625_v30, %v421_v22 }
  0xa0   : > { %v636_v36 = vadd.f32 %v635_v32, %v423_v27 }
  0xa2   : > { %v637_v38 = vsub.f32 %v636_v36, %v626_v34 }
  0xa4   : > { %v889_v13 = vclamps-f32 %v637_v38, 30.0 }
  0xa6   : > { %v640_v44 = vmul.f32 1.442695, %v889_v13 }
  0xa8   : > { %930 = vpow2.f32 %v640_v44 }
  0xb2   : > { %v931_v41 = vpop.eup %930 }
  0xb3   : > { %v642_v42 = vadd.f32 1.0, %v931_v41 }
  0xb5   : > { %932 = vrcp.f32 %v642_v42 }
  0xbc   : > { %654 = sbr.rel (!%p1592_p4) target bundleno = 203 (0xcb), region = 74 }
  0xbf   : > { %v933_v45 = vpop.eup %932 }
  0xc0   : > { %644 = vst [vmem:[%s189_s21] sm:$0xff] %v933_v45  ;;  %v645_v53 = vsub.f32 1.0, %v933_v45 }
  0xc2   : > { %890 = vst [vmem:[%s189_s21 + $0x8] sm:$0xff] %v645_v53 }
  0xc7   : > { %v686_v46 = vld [vmem:[%s189_s21] sm:$0xff] }
  0xc8   : > { %687 = vst [vmem:[%s656_s25] sm:$0xff] %v686_v46 }
  0xc9   : > { %v688_v2 = vld [vmem:[%s189_s21 + $0x8] sm:$0xff] }
  0xca   : > { %689 = vst [vmem:[%s656_s25 + $0x10] sm:$0xff] %v688_v2 }
  0xcb PF: > { %s1595_s11 = sld [smem:[#allocation9_spill]]  ;;  %s1596_s9 = sld [smem:[#allocation7_spill]] }
  0xcc   : > { %s1597_s10 = sld [smem:[#allocation10_spill]] }
  0xd1   : > { %p10_p5 = scmp.ge.s32.totalorder %s1595_s11, 4  }
  0xd3   :  { %12 = sbr.rel (!%p10_p5) target bundleno = 6 (0x6), region = 146 }
  0xda   :  { %705 = vsyncpa [#allocation3], 1 }
  0xdb   :  { %707 = vsyncpa [#allocation3 + $0x1], 1 }

</bundles_post_ra>
